<compile_context>
chip_gen: v5e
topology: v5e:2x2
jax: 0.10.0
libtpu: 0.0.40
codegen_flags: <defaults>
</compile_context>

<pallas_src>
import jax
import jax.numpy as jnp
from jax.experimental import pallas as pl
from jax.experimental.pallas import tpu as pltpu


def _round_up(x, m):
    return (x + m - 1) // m * m


def icm_reward_kernel(
    s0_ref, s1_ref, a_ref,                 # per-batch-tile inputs  [TB, obs_p]/[TB, act_p]
    w1_ref, b1_ref, w2_ref, b2_ref,        # feature_net params (weights in compute dtype, biases f32)
    wf1p_ref, wf1a_ref, bf1_ref,           # forward_head layer-1 params (concat split into phi/act parts)
    wf2_ref, bf2_ref,                      # forward_head layer-2 params
    r_ref,                                 # output: [1, TB]  lane-dense intrinsic-reward row
    x01_ref,                               # VMEM scratch: [2*TB, obs_p] stacked (s0; s1)
):
    tb = s0_ref.shape[0]
    cdt = s0_ref.dtype                     # compute dtype of the matmul operands (bf16 or f32)

    # --- Row-stack s_0 / s_1 so feature_net runs once with doubled M (better MXU occupancy).
    x01_ref[pl.ds(0, tb), :] = s0_ref[...]
    x01_ref[pl.ds(tb, tb), :] = s1_ref[...]

    # --- feature_net(x) = relu(x @ W1 + b1) @ W2 + b2, f32 accumulation, bias/ReLU in f32.
    h = jnp.dot(x01_ref[...], w1_ref[...], preferred_element_type=jnp.float32) + b1_ref[...]
    h = jnp.maximum(h, 0.0).astype(cdt)
    phi = jnp.dot(h, w2_ref[...], preferred_element_type=jnp.float32) + b2_ref[...]   # [2*TB, F] f32

    phi_0 = phi[:tb]                       # encoding of s_0
    phi_1 = phi[tb:]                       # true next encoding

    # --- forward_head(concat(phi_0, a)) with the concat folded into a split matmul:
    #       concat(phi_0, a) @ Wf1 == phi_0 @ Wf1[:F] + a @ Wf1[F:]
    z = (jnp.dot(phi_0.astype(cdt), wf1p_ref[...], preferred_element_type=jnp.float32)
         + jnp.dot(a_ref[...], wf1a_ref[...], preferred_element_type=jnp.float32)
         + bf1_ref[...])
    z = jnp.maximum(z, 0.0).astype(cdt)
    pred_phi_1 = jnp.dot(z, wf2_ref[...], preferred_element_type=jnp.float32) + bf2_ref[...]  # [TB, F]

    # --- r_i = ||phi_1 - pred_phi_1||_2 / 2
    d = phi_1 - pred_phi_1                 # [TB, F] f32
    dsq = d * d
    # Fused lane-reduce + transpose: ones[1,F] . dsq[TB,F]^T -> [1,TB] (lane-dense),
    # so the final store is an unmasked, full-lane vst.
    ones_row = jnp.ones((1, dsq.shape[-1]), jnp.float32)
    sq_row = jax.lax.dot_general(
        ones_row, dsq,
        dimension_numbers=(((1,), (1,)), ((), ())),
        preferred_element_type=jnp.float32)            # [1, TB]
    r_ref[...] = jnp.sqrt(sq_row) * 0.5


def icm_intrinsic_reward(s_0, s_1, a, params, *, tile_b=256, compute_dtype=jnp.bfloat16):
    """Returns r_i of shape [B] (float32).

    tile_b: batch tile (rows per grid step). Must be a multiple of 128 so the
    lane-dense output row is full-width and the MXU M dim is well fed.
    Suggested: 512-1024 on v5e/v6e, 256-512 on v7x (64 MiB VMEM). Default 256
    fits every generation's VMEM budget with large margin.
    """
    B, obs_dim = s_0.shape
    act_dim = a.shape[-1]
    (w1, b1, w2, b2, wf1, bf1, wf2, bf2) = params
    hidden = w1.shape[1]
    feat = w2.shape[1]

    assert tile_b % 128 == 0, "tile_b must be a multiple of 128 (lane-dense output, MXU/sublane alignment)"

    # Pad every contraction / lane dim to a multiple of 128 (full vregs, MXU-native widths).
    obs_p = _round_up(obs_dim, 128)
    act_p = _round_up(act_dim, 128)
    hid_p = _round_up(hidden, 128)
    fea_p = _round_up(feat, 128)
    b_pad = _round_up(B, tile_b)
    grid = (b_pad // tile_b,)

    def pad2(x, r, c):
        return jnp.pad(x, ((0, r - x.shape[0]), (0, c - x.shape[1])))

    # Batch-major activations: cast matmul operands to the compute dtype (bf16 by default).
    s0p = pad2(s_0, b_pad, obs_p).astype(compute_dtype)
    s1p = pad2(s_1, b_pad, obs_p).astype(compute_dtype)
    ap = pad2(a, b_pad, act_p).astype(compute_dtype)

    # Weights in compute dtype; forward_head first-layer weight split into phi / action parts.
    w1p = pad2(w1, obs_p, hid_p).astype(compute_dtype)
    w2p = pad2(w2, hid_p, fea_p).astype(compute_dtype)
    wf1_phi = pad2(wf1[:feat, :], fea_p, hid_p).astype(compute_dtype)
    wf1_act = pad2(wf1[feat:, :], act_p, hid_p).astype(compute_dtype)
    wf2p = pad2(wf2, hid_p, fea_p).astype(compute_dtype)

    # Biases stay f32 (added onto the f32 accumulators), 2-D so every operand is rank-2.
    b1p = jnp.pad(b1, (0, hid_p - hidden)).reshape(1, -1).astype(jnp.float32)
    b2p = jnp.pad(b2, (0, fea_p - feat)).reshape(1, -1).astype(jnp.float32)
    bf1p = jnp.pad(bf1, (0, hid_p - hidden)).reshape(1, -1).astype(jnp.float32)
    bf2p = jnp.pad(bf2, (0, fea_p - feat)).reshape(1, -1).astype(jnp.float32)

    batch_spec = lambda d: pl.BlockSpec((tile_b, d), lambda i: (i, 0))
    full_spec = lambda r, c: pl.BlockSpec((r, c), lambda i: (0, 0))

    out = pl.pallas_call(
        icm_reward_kernel,
        # Lane-dense output: one (1, tile_b) row per grid step into a (1, B_pad) slab.
        out_shape=jax.ShapeDtypeStruct((1, b_pad), jnp.float32),
        grid_spec=pltpu.PrefetchScalarGridSpec(
            num_scalar_prefetch=0,
            grid=grid,
            in_specs=[
                batch_spec(obs_p),                # s_0
                batch_spec(obs_p),                # s_1
                batch_spec(act_p),                # a
                full_spec(obs_p, hid_p),          # W1
                full_spec(1, hid_p),              # b1
                full_spec(hid_p, fea_p),          # W2
                full_spec(1, fea_p),              # b2
                full_spec(fea_p, hid_p),          # Wf1 (phi part)
                full_spec(act_p, hid_p),          # Wf1 (action part)
                full_spec(1, hid_p),              # bf1
                full_spec(hid_p, fea_p),          # Wf2
                full_spec(1, fea_p),              # bf2
            ],
            out_specs=pl.BlockSpec((1, tile_b), lambda i: (0, i)),
            scratch_shapes=[pltpu.VMEM((2 * tile_b, obs_p), compute_dtype)],
        ),
        compiler_params=pltpu.CompilerParams(
            dimension_semantics=("parallel",)),   # batch tiles shard across megacore TCs
    )(s0p, s1p, ap, w1p, b1p, w2p, b2p, wf1_phi, wf1_act, bf1p, wf2p, bf2p)

    return out[0, :B]


def reference_icm(s_0, s_1, a, params):
    (w1, b1, w2, b2, wf1, bf1, wf2, bf2) = params

    def feature_net(x):
        return jnp.maximum(x @ w1 + b1, 0.0) @ w2 + b2

    phi_0 = feature_net(s_0)
    phi_1 = feature_net(s_1)
    z = jnp.concatenate([phi_0, a], axis=-1)
    pred_phi_1 = jnp.maximum(z @ wf1 + bf1, 0.0) @ wf2 + bf2
    return jnp.linalg.norm(phi_1 - pred_phi_1, axis=-1) / 2.0


if __name__ == "__main__":
    # Small, forward-consistent shapes; B chosen so the grid has 2 steps (pipelining/megacore).
    B, OBS, ACT, HID, FEAT = 512, 16, 4, 32, 32

    key = jax.random.PRNGKey(0)
    ks = jax.random.split(key, 11)

    s_0 = jax.random.normal(ks[0], (B, OBS), jnp.float32)
    s_1 = jax.random.normal(ks[1], (B, OBS), jnp.float32)
    a = jax.random.normal(ks[2], (B, ACT), jnp.float32)

    def init_linear(kw, kb, fan_in, fan_out):
        lim = 1.0 / jnp.sqrt(fan_in)
        w = jax.random.uniform(kw, (fan_in, fan_out), jnp.float32, -lim, lim)
        b = jax.random.uniform(kb, (fan_out,), jnp.float32, -lim, lim)
        return w, b

    # feature_net: obs -> hidden -> feat
    w1, b1 = init_linear(ks[3], ks[4], OBS, HID)
    w2, b2 = init_linear(ks[5], ks[6], HID, FEAT)
    # forward_head: (feat + act) -> hidden -> feat
    wf1, bf1 = init_linear(ks[7], ks[8], FEAT + ACT, HID)
    wf2, bf2 = init_linear(ks[9], ks[10], HID, FEAT)

    params = (w1, b1, w2, b2, wf1, bf1, wf2, bf2)
    r_ref = reference_icm(s_0, s_1, a, params)

    # f32 compute path: near-exact match with the reference.
    r_f32 = jax.block_until_ready(
        icm_intrinsic_reward(s_0, s_1, a, params, compute_dtype=jnp.float32))
    assert r_f32.shape == (B,)
    assert jnp.allclose(r_f32, r_ref, rtol=2e-2, atol=2e-2), (r_f32[:4], r_ref[:4])

    # bf16 compute path (production default): loose tolerance for reduced-precision matmuls.
    r_bf16 = jax.block_until_ready(icm_intrinsic_reward(s_0, s_1, a, params))
    assert r_bf16.shape == (B,)
    assert jnp.allclose(r_bf16, r_ref, rtol=1e-1, atol=5e-2), (r_bf16[:4], r_ref[:4])

    # TODO(synk): _calc_loss / _update (inverse_head + Adam training step) are not part of
    # forward() and are intentionally not implemented as kernels.
    print("KERNEL_OK")
</pallas_src>

<mosaic_0001>
module attributes {stable_mosaic.version = 11 : i64} {
  func.func @icm_reward_kernel(%arg0: i32, %arg1: memref<256x128xf32, #tpu.memory_space<vmem>>, %arg2: memref<256x128xf32, #tpu.memory_space<vmem>>, %arg3: memref<256x128xf32, #tpu.memory_space<vmem>>, %arg4: memref<128x128xf32, #tpu.memory_space<vmem>>, %arg5: memref<1x128xf32, #tpu.memory_space<vmem>>, %arg6: memref<128x128xf32, #tpu.memory_space<vmem>>, %arg7: memref<1x128xf32, #tpu.memory_space<vmem>>, %arg8: memref<128x128xf32, #tpu.memory_space<vmem>>, %arg9: memref<128x128xf32, #tpu.memory_space<vmem>>, %arg10: memref<1x128xf32, #tpu.memory_space<vmem>>, %arg11: memref<128x128xf32, #tpu.memory_space<vmem>>, %arg12: memref<1x128xf32, #tpu.memory_space<vmem>>, %arg13: memref<1x256xf32, #tpu.memory_space<vmem>>, %arg14: memref<512x128xf32, #tpu.memory_space<vmem>>) attributes {dimension_semantics = [#tpu.dimension_semantics<parallel>], iteration_bounds = array<i64: 2>, scalar_prefetch = 0 : i64, scratch_operands = 1 : i64, tpu.core_type = #tpu.core_type<tc>, window_params = [{transform_indices = @transform_0, window_bounds = array<i64: 256, 128>}, {transform_indices = @transform_1, window_bounds = array<i64: 256, 128>}, {transform_indices = @transform_2, window_bounds = array<i64: 256, 128>}, {pipeline_mode = #tpu.pipeline_mode<synchronous>, transform_indices = @transform_3, window_bounds = array<i64: 128, 128>}, {pipeline_mode = #tpu.pipeline_mode<synchronous>, transform_indices = @transform_4, window_bounds = array<i64: 1, 128>}, {pipeline_mode = #tpu.pipeline_mode<synchronous>, transform_indices = @transform_5, window_bounds = array<i64: 128, 128>}, {pipeline_mode = #tpu.pipeline_mode<synchronous>, transform_indices = @transform_6, window_bounds = array<i64: 1, 128>}, {pipeline_mode = #tpu.pipeline_mode<synchronous>, transform_indices = @transform_7, window_bounds = array<i64: 128, 128>}, {pipeline_mode = #tpu.pipeline_mode<synchronous>, transform_indices = @transform_8, window_bounds = array<i64: 128, 128>}, {pipeline_mode = #tpu.pipeline_mode<synchronous>, transform_indices = @transform_9, window_bounds = array<i64: 1, 128>}, {pipeline_mode = #tpu.pipeline_mode<synchronous>, transform_indices = @transform_10, window_bounds = array<i64: 128, 128>}, {pipeline_mode = #tpu.pipeline_mode<synchronous>, transform_indices = @transform_11, window_bounds = array<i64: 1, 128>}, {transform_indices = @transform_12, window_bounds = array<i64: 1, 256>}]} {
    %c0 = arith.constant 0 : index
    %c0_0 = arith.constant 0 : index
    %0 = vector.load %arg1[%c0, %c0_0] : memref<256x128xf32, #tpu.memory_space<vmem>>, vector<256x128xf32>
    %c0_1 = arith.constant 0 : index
    %c0_2 = arith.constant 0 : index
    %1 = vector.load %arg14[%c0_1, %c0_2] : memref<512x128xf32, #tpu.memory_space<vmem>>, vector<256x128xf32>
    tpu.vector_store %arg14[%c0_1, %c0_2], %0 {strides = array<i32>} : memref<512x128xf32, #tpu.memory_space<vmem>>, vector<256x128xf32>,
    %c0_3 = arith.constant 0 : index
    %c0_4 = arith.constant 0 : index
    %2 = vector.load %arg2[%c0_3, %c0_4] : memref<256x128xf32, #tpu.memory_space<vmem>>, vector<256x128xf32>
    %c256 = arith.constant 256 : index
    %c0_5 = arith.constant 0 : index
    %3 = vector.load %arg14[%c256, %c0_5] : memref<512x128xf32, #tpu.memory_space<vmem>>, vector<256x128xf32>
    tpu.vector_store %arg14[%c256, %c0_5], %2 {strides = array<i32>} : memref<512x128xf32, #tpu.memory_space<vmem>>, vector<256x128xf32>,
    %c0_6 = arith.constant 0 : index
    %c0_7 = arith.constant 0 : index
    %4 = vector.load %arg14[%c0_6, %c0_7] : memref<512x128xf32, #tpu.memory_space<vmem>>, vector<512x128xf32>
    %c0_8 = arith.constant 0 : index
    %c0_9 = arith.constant 0 : index
    %5 = vector.load %arg4[%c0_8, %c0_9] : memref<128x128xf32, #tpu.memory_space<vmem>>, vector<128x128xf32>
    %cst = arith.constant dense<0.000000e+00> : vector<512x128xf32>
    %6 = tpu.matmul %4, %5, %cst {dimension_numbers = #tpu.dot_dimension_numbers<[1], [0], [0], [1], [0, 0, 1, 1], [], []>} : vector<512x128xf32>, vector<128x128xf32>, vector<512x128xf32> -> vector<512x128xf32>
    %c0_10 = arith.constant 0 : index
    %c0_11 = arith.constant 0 : index
    %7 = vector.load %arg5[%c0_10, %c0_11] : memref<1x128xf32, #tpu.memory_space<vmem>>, vector<1x128xf32>
    %8 = vector.broadcast %7 : vector<1x128xf32> to vector<512x128xf32>
    %9 = arith.addf %6, %8 : vector<512x128xf32>
    %cst_12 = arith.constant 0.000000e+00 : f32
    %10 = vector.broadcast %cst_12 : f32 to vector<512x128xf32>
    %11 = arith.maximumf %9, %10 : vector<512x128xf32>
    %c0_13 = arith.constant 0 : index
    %c0_14 = arith.constant 0 : index
    %12 = vector.load %arg6[%c0_13, %c0_14] : memref<128x128xf32, #tpu.memory_space<vmem>>, vector<128x128xf32>
    %cst_15 = arith.constant dense<0.000000e+00> : vector<512x128xf32>
    %13 = tpu.matmul %11, %12, %cst_15 {dimension_numbers = #tpu.dot_dimension_numbers<[1], [0], [0], [1], [0, 0, 1, 1], [], []>} : vector<512x128xf32>, vector<128x128xf32>, vector<512x128xf32> -> vector<512x128xf32>
    %c0_16 = arith.constant 0 : index
    %c0_17 = arith.constant 0 : index
    %14 = vector.load %arg7[%c0_16, %c0_17] : memref<1x128xf32, #tpu.memory_space<vmem>>, vector<1x128xf32>
    %15 = vector.broadcast %14 : vector<1x128xf32> to vector<512x128xf32>
    %16 = arith.addf %13, %15 : vector<512x128xf32>
    %17 = vector.extract_strided_slice %16 {offsets = [0, 0], sizes = [256, 128], strides = [1, 1]} : vector<512x128xf32> to vector<256x128xf32>
    %18 = vector.extract_strided_slice %16 {offsets = [256, 0], sizes = [256, 128], strides = [1, 1]} : vector<512x128xf32> to vector<256x128xf32>
    %c0_18 = arith.constant 0 : index
    %c0_19 = arith.constant 0 : index
    %19 = vector.load %arg8[%c0_18, %c0_19] : memref<128x128xf32, #tpu.memory_space<vmem>>, vector<128x128xf32>
    %cst_20 = arith.constant dense<0.000000e+00> : vector<256x128xf32>
    %20 = tpu.matmul %17, %19, %cst_20 {dimension_numbers = #tpu.dot_dimension_numbers<[1], [0], [0], [1], [0, 0, 1, 1], [], []>} : vector<256x128xf32>, vector<128x128xf32>, vector<256x128xf32> -> vector<256x128xf32>
    %c0_21 = arith.constant 0 : index
    %c0_22 = arith.constant 0 : index
    %21 = vector.load %arg3[%c0_21, %c0_22] : memref<256x128xf32, #tpu.memory_space<vmem>>, vector<256x128xf32>
    %c0_23 = arith.constant 0 : index
    %c0_24 = arith.constant 0 : index
    %22 = vector.load %arg9[%c0_23, %c0_24] : memref<128x128xf32, #tpu.memory_space<vmem>>, vector<128x128xf32>
    %cst_25 = arith.constant dense<0.000000e+00> : vector<256x128xf32>
    %23 = tpu.matmul %21, %22, %cst_25 {dimension_numbers = #tpu.dot_dimension_numbers<[1], [0], [0], [1], [0, 0, 1, 1], [], []>} : vector<256x128xf32>, vector<128x128xf32>, vector<256x128xf32> -> vector<256x128xf32>
    %24 = arith.addf %20, %23 : vector<256x128xf32>
    %c0_26 = arith.constant 0 : index
    %c0_27 = arith.constant 0 : index
    %25 = vector.load %arg10[%c0_26, %c0_27] : memref<1x128xf32, #tpu.memory_space<vmem>>, vector<1x128xf32>
    %26 = vector.broadcast %25 : vector<1x128xf32> to vector<256x128xf32>
    %27 = arith.addf %24, %26 : vector<256x128xf32>
    %cst_28 = arith.constant 0.000000e+00 : f32
    %28 = vector.broadcast %cst_28 : f32 to vector<256x128xf32>
    %29 = arith.maximumf %27, %28 : vector<256x128xf32>
    %c0_29 = arith.constant 0 : index
    %c0_30 = arith.constant 0 : index
    %30 = vector.load %arg11[%c0_29, %c0_30] : memref<128x128xf32, #tpu.memory_space<vmem>>, vector<128x128xf32>
    %cst_31 = arith.constant dense<0.000000e+00> : vector<256x128xf32>
    %31 = tpu.matmul %29, %30, %cst_31 {dimension_numbers = #tpu.dot_dimension_numbers<[1], [0], [0], [1], [0, 0, 1, 1], [], []>} : vector<256x128xf32>, vector<128x128xf32>, vector<256x128xf32> -> vector<256x128xf32>
    %c0_32 = arith.constant 0 : index
    %c0_33 = arith.constant 0 : index
    %32 = vector.load %arg12[%c0_32, %c0_33] : memref<1x128xf32, #tpu.memory_space<vmem>>, vector<1x128xf32>
    %33 = vector.broadcast %32 : vector<1x128xf32> to vector<256x128xf32>
    %34 = arith.addf %31, %33 : vector<256x128xf32>
    %35 = arith.subf %18, %34 : vector<256x128xf32>
    %36 = arith.mulf %35, %35 : vector<256x128xf32>
    %cst_34 = arith.constant 1.000000e+00 : f32
    %37 = vector.broadcast %cst_34 : f32 to vector<1x128xf32>
    %cst_35 = arith.constant dense<0.000000e+00> : vector<1x256xf32>
    %38 = tpu.matmul %37, %36, %cst_35 {dimension_numbers = #tpu.dot_dimension_numbers<[1], [1], [0], [0], [0, 0, 1, 0], [], []>} : vector<1x128xf32>, vector<256x128xf32>, vector<1x256xf32> -> vector<1x256xf32>
    %39 = math.sqrt %38 : vector<1x256xf32>
    %cst_36 = arith.constant 5.000000e-01 : f32
    %40 = vector.broadcast %cst_36 : f32 to vector<1x256xf32>
    %41 = arith.mulf %39, %40 : vector<1x256xf32>
    %c0_37 = arith.constant 0 : index
    %c0_38 = arith.constant 0 : index
    %42 = vector.load %arg13[%c0_37, %c0_38] : memref<1x256xf32, #tpu.memory_space<vmem>>, vector<1x256xf32>
    tpu.vector_store %arg13[%c0_37, %c0_38], %41 {strides = array<i32>} : memref<1x256xf32, #tpu.memory_space<vmem>>, vector<1x256xf32>,
    return
  }
  func.func @transform_0(%arg0: i32) -> (i32, i32) {
    %c0_i32 = arith.constant 0 : i32
    %c0_i32_0 = arith.constant 0 : i32
    return %arg0, %c0_i32 : i32, i32
  }
  func.func @transform_1(%arg0: i32) -> (i32, i32) {
    %c0_i32 = arith.constant 0 : i32
    %c0_i32_0 = arith.constant 0 : i32
    return %arg0, %c0_i32 : i32, i32
  }
  func.func @transform_2(%arg0: i32) -> (i32, i32) {
    %c0_i32 = arith.constant 0 : i32
    %c0_i32_0 = arith.constant 0 : i32
    return %arg0, %c0_i32 : i32, i32
  }
  func.func @transform_3(%arg0: i32) -> (i32, i32) {
    %c0_i32 = arith.constant 0 : i32
    %c0_i32_0 = arith.constant 0 : i32
    %c0_i32_1 = arith.constant 0 : i32
    return %c0_i32, %c0_i32_0 : i32, i32
  }
  func.func @transform_4(%arg0: i32) -> (i32, i32) {
    %c0_i32 = arith.constant 0 : i32
    %c0_i32_0 = arith.constant 0 : i32
    %c0_i32_1 = arith.constant 0 : i32
    return %c0_i32, %c0_i32_0 : i32, i32
  }
  func.func @transform_5(%arg0: i32) -> (i32, i32) {
    %c0_i32 = arith.constant 0 : i32
    %c0_i32_0 = arith.constant 0 : i32
    %c0_i32_1 = arith.constant 0 : i32
    return %c0_i32, %c0_i32_0 : i32, i32
  }
  func.func @transform_6(%arg0: i32) -> (i32, i32) {
    %c0_i32 = arith.constant 0 : i32
    %c0_i32_0 = arith.constant 0 : i32
    %c0_i32_1 = arith.constant 0 : i32
    return %c0_i32, %c0_i32_0 : i32, i32
  }
  func.func @transform_7(%arg0: i32) -> (i32, i32) {
    %c0_i32 = arith.constant 0 : i32
    %c0_i32_0 = arith.constant 0 : i32
    %c0_i32_1 = arith.constant 0 : i32
    return %c0_i32, %c0_i32_0 : i32, i32
  }
  func.func @transform_8(%arg0: i32) -> (i32, i32) {
    %c0_i32 = arith.constant 0 : i32
    %c0_i32_0 = arith.constant 0 : i32
    %c0_i32_1 = arith.constant 0 : i32
    return %c0_i32, %c0_i32_0 : i32, i32
  }
  func.func @transform_9(%arg0: i32) -> (i32, i32) {
    %c0_i32 = arith.constant 0 : i32
    %c0_i32_0 = arith.constant 0 : i32
    %c0_i32_1 = arith.constant 0 : i32
    return %c0_i32, %c0_i32_0 : i32, i32
  }
  func.func @transform_10(%arg0: i32) -> (i32, i32) {
    %c0_i32 = arith.constant 0 : i32
    %c0_i32_0 = arith.constant 0 : i32
    %c0_i32_1 = arith.constant 0 : i32
    return %c0_i32, %c0_i32_0 : i32, i32
  }
  func.func @transform_11(%arg0: i32) -> (i32, i32) {
    %c0_i32 = arith.constant 0 : i32
    %c0_i32_0 = arith.constant 0 : i32
    %c0_i32_1 = arith.constant 0 : i32
    return %c0_i32, %c0_i32_0 : i32, i32
  }
  func.func @transform_12(%arg0: i32) -> (i32, i32) {
    %c0_i32 = arith.constant 0 : i32
    %c0_i32_0 = arith.constant 0 : i32
    return %c0_i32, %arg0 : i32, i32
  }
}

</mosaic_0001>

<bundles_post_ra>
// kernel: tpu_custom_call.1
= control target key start
LH: loop header
LB: loop body
LE: loop exit
PB: predicated region body
PF: predicated region fallthrough
CT: control target
= control target key end

     0   :  { %s3489_s0 = inlined_call_operand.hbm [shape: f32[512,128], index: 0, kind: input, shape index: {}]   ;;  %s3490_s1 = inlined_call_operand.hbm [shape: f32[512,128], index: 1, kind: input, shape index: {}]   ;;  %s3491_s2 = inlined_call_operand.hbm [shape: f32[512,128], index: 2, kind: input, shape index: {}]   ;;  %s3492_s3 = inlined_call_operand.hbm [shape: f32[128,128], index: 3, kind: input, shape index: {}]   ;;  %s3493_s4 = inlined_call_operand.vmem [shape: f32[1,128], index: 4, kind: input, shape index: {}]   ;;  %s3494_s5 = inlined_call_operand.hbm [shape: f32[128,128], index: 5, kind: input, shape index: {}]   ;;  %s3495_s6 = inlined_call_operand.vmem [shape: f32[1,128], index: 6, kind: input, shape index: {}]   ;;  %s3496_s7 = inlined_call_operand.hbm [shape: f32[128,128], index: 7, kind: input, shape index: {}]   ;;  %s3497_s8 = inlined_call_operand.hbm [shape: f32[128,128], index: 8, kind: input, shape index: {}]   ;;  %s3498_s9 = inlined_call_operand.vmem [shape: f32[1,128], index: 9, kind: input, shape index: {}]   ;;  %s3499_s10 = inlined_call_operand.hbm [shape: f32[128,128], index: 10, kind: input, shape index: {}]   ;;  %s3500_s11 = inlined_call_operand.vmem [shape: f32[1,128], index: 11, kind: input, shape index: {}]   ;;  %s3501_s12 = inlined_call_operand.hbm [shape: f32[1,512], index: 12, kind: output, shape index: {}]  }
   0x1   :  { %3516 = sst [smem:[#allocation30_spill]] %s3490_s1 }
   0x2   :  { %3517 = sst [smem:[#allocation31_spill]] %s3492_s3 }
   0x3   :  { %3518 = sst [smem:[#allocation32_spill]] %s3494_s5 }
   0x4   :  { %3519 = sst [smem:[#allocation33_spill]] %s3496_s7 }
   0x5   :  { %3520 = sst [smem:[#allocation34_spill]] %s3500_s11 }
   0x6   :  { %3521 = sst [smem:[#allocation35_spill]] %s3501_s12 }
   0x7   :  { %17 = vsyncpa [#allocation4], 0 }
   0x8   :  { %19 = vsyncpa [#allocation4 + $0x1], 0 }
   0x9   :  { %20 = vsyncpa [#allocation7], 0 }
   0xa   :  { %22 = vsyncpa [#allocation7 + $0x1], 0 }
   0xb   :  { %23 = vsyncpa [#allocation10], 0 }
   0xc   :  { %24 = vsyncpa [#allocation13], 0 }
   0xd   :  { %25 = vsyncpa [#allocation16], 0 }
   0xe   :  { %26 = vsyncpa [#allocation5], 0 }
   0xf   :  { %28 = vsyncpa [#allocation5 + $0x1], 0  ;;  %s2724_s21 = smov 0   ;;  %s2726_s22 = smov 0  }
  0x10   :  { %s2728_s23 = smov 0   ;;  %s2730_s24 = smov 0  }
  0x11 LB: > { %3522 = sst [smem:[#allocation24_spill]] %s2637_s21  ;;  %s2748_s28 = sadd.s32 4294967295, %s2649_s24   ;;  %s2649_s24 = sphi %s2730_s24, %s3554_s24   ;;  %s2645_s23 = sphi %s2728_s23, %s3558_s23   ;;  %s2641_s22 = sphi %s2726_s22, %s3557_s22   ;;  %s2637_s21 = sphi %s2724_s21, %s3556_s21  }
  0x12   : > { %3523 = sst [smem:[#allocation25_spill]] %s2649_s24  ;;  %p2126_p0 = scmp.ge.s32.totalorder %s2649_s24, 1 }
  0x13   : > { %s3524_s3 = sld [smem:[#allocation31_spill]]  ;;  %p3514_p1 = scmp.eq.s32.totalorder %s2748_s28, 0 }
  0x14   : > { %p319_p2 = scmp.eq.s32.totalorder %s2748_s28, 1  ;;  %p332_p3 = scmp.lt.s32.totalorder %s2649_s24, 3 }
  0x15   : > { %s2651_s30 = smov [#allocation9]   ;;  %s3526_s7 = sld [smem:[#allocation33_spill]] }
  0x16   : > { %p2754_p4 = pnand %p2126_p0, %p332_p3  ;;  %s345_s13 = sshll.u32 %s2651_s30, 4  ;;  %s346_s13 = int_to_ptr.vmem [resolvable:$true] %s345_s13 }
  0x17   : > { %s2652_s18 = smov [#allocation12]   ;;  %s3502_s20 = smov 128  }
  0x18   : > { %p2235_p5 = pneg %p2754_p4  ;;  %s379_s19 = sshll.u32 %s2652_s18, 4  ;;  %s380_s19 = int_to_ptr.vmem [resolvable:$true] %s379_s19 }
  0x19   : > { %s343_s27 = sshll.u32 %s3524_s3, 4  ;;  %s3504_s25 = smov 8   ;;  %s344_s27 = int_to_ptr.hbm [resolvable:$true] %s343_s27 }
  0x1a   : > { %p2766_p7 = pnand %p2235_p5, %p3514_p1  ;;  %s2125_s26 = sadd.s32 4294967294, %s2649_s24  }
  0x1b   : > { %s377_s16 = sshll.u32 %s3526_s7, 4  ;;  %s2782_s30 = sadd.s32 1, %s2649_s24   ;;  %s378_s16 = int_to_ptr.hbm [resolvable:$true] %s377_s16 }
  0x1c   : > { %2238 = dma.hbm_to_vmem [thread:$0]  (!%p2766_p7), %s344_s27, 2048, %s346_s13, [#allocation10], %s3502_s20, %s3502_s20, %s3504_s25  }
  0x1d   : > { %2244 = dma.hbm_to_vmem [thread:$0]  (!%p2766_p7), %s378_s16, 2048, %s380_s19, [#allocation13], %s3502_s20, %s3502_s20, %s3504_s25  }
  0x1e   : > { %3528 = sst [smem:[#allocation26_spill]] %s2782_s30  ;;  %s41_s14 = sadd.s32 1, %s2645_s23 }
  0x1f   : > { %s38_s15 = ssub.s32 %s2649_s24, %s2782_s30  ;;  %p48_p8 = scmp.ne.s32.totalorder %s2645_s23, %s2641_s22 }
  0x20   : > { %p39_p9 = scmp.eq.s32.totalorder %s38_s15, 0  ;;  %p49_p10 = scmp.eq.s32.totalorder %s2649_s24, 0 }
  0x21   : > { %p54_p11 = scmp.ne.s32.totalorder %s2641_s22, %s2637_s21  ;;  %p2794_p12 = por %p319_p2, %p48_p8 }
  0x22   : > { %s2799_s13 = scalar_select %p39_p9, %s2645_s23, %s41_s14  }
  0x23   : > { %s3529_s27 = scalar_select %p2794_p12, 1, 0 }
  0x24   : > { %3531 = sst [smem:[#allocation28_spill]] %s2799_s13  ;;  %p50_p13 = por %p49_p10, %p48_p8 }
  0x25   : > { %3530 = sst [smem:[#allocation27_spill]] %s3529_s27  ;;  %p2803_p0 = por %p3514_p1, %p54_p11 }
  0x26   : > { %p325_p3 = scmp.eq.s32.totalorder %s2125_s26, 1  ;;  %p2270_p5 = scmp.lt.s32.totalorder %s2649_s24, 2 }
  0x27   : > { %s3510_s18 = sand.u32 1, %s2645_s23   ;;  %s2810_s19 = sshll.u32 %s2649_s24, 8 }
  0x28   : > { %p2812_p6 = por %p325_p3, %p54_p11  ;;  %s2818_s20 = sshll.u32 %s3510_s18, 8 }
  0x29   : > { %p2820_p2 = pnand %p2270_p5, %p50_p13  ;;  %s449_s26 = sand.u32 1, %s2649_s24  }
  0x2a   : > { %s3533_s15 = scalar_select %p2812_p6, 1, 0 }
  0x2b   : > { %s3536_s1 = sld [smem:[#allocation30_spill]]  ;;  %s453_s30 = scalar_lea.vmem [#allocation6], %s2818_s20 }
  0x2c   : > { %3534 = sst [smem:[#allocation29_spill]] %s3533_s15  ;;  %s461_s21 = sshll.u32 %s453_s30, 4  ;;  %s462_s21 = int_to_ptr.vmem [resolvable:$true] %s461_s21 }
  0x2d   : > { %s2830_s15 = scalar_lea.sflag [#allocation7], %s449_s26  ;;  %p2391_p9 = pneg %p2820_p2 }
  0x31   : > { %s458_s7 = scalar_lea.hbm %s3536_s1, %s2810_s19 }
  0x32   : > { %s459_s13 = sshll.u32 %s458_s7, 4  ;;  %s2394_s7 = scalar_lea.hbm %s3536_s1, 512  ;;  %s460_s13 = int_to_ptr.hbm [resolvable:$true] %s459_s13 }
  0x33   : > { %s2387_s18 = sshra.s32 %s460_s13, 4  ;;  %s2388_s18 = int_to_ptr.hbm [resolvable:$true] %s2387_s18 }
  0x34   : > { %s2389_s27 = scalar_lea.hbm %s2388_s18, 256  ;;  %p2395_p13 = scmp.lt.s32.totalorder %s2388_s18, %s3536_s1 }
  0x35   : > { %p2390_p8 = scmp.ne.s32.totalorder %s2388_s18, %s2389_s27  ;;  %p2396_p3 = scmp.lt.s32.totalorder %s2394_s7, %s2389_s27 }
  0x37   : > { %p2392_p10 = pnand %p2391_p9, %p2390_p8  ;;  %p2397_p5 = por %p2396_p3, %p2395_p13 }
  0x39   : > { %p2393_p11 = pneg %p2392_p10 }
  0x3b   : > { %p2398_p1 = pnand %p2397_p5, %p2393_p11 }
  0x3d   : > { %2401 = shalt.err (!%p2398_p1)
}
  0x3e   : > { %s3537_s26 = smov 8   ;;  %s3538_s12 = smov 128  }
  0x3f   : > { %2257 = dma.hbm_to_vmem [thread:$0]  (!%p2820_p2), %s460_s13, 4096, %s462_s21, %s2830_s15, %s3538_s12, %s3538_s12, %s3537_s26  }
  0x40   : > { %s3539_s5 = sld [smem:[#allocation32_spill]]  ;;  %s2655_s18 = smov [#allocation11]  }
  0x41   : > { %s362_s27 = sshll.u32 %s2655_s18, 4  ;;  %s391_s30 = sshll.u32 %s3497_s8, 4  ;;  %s363_s27 = int_to_ptr.vmem [resolvable:$true] %s362_s27  ;;  %s392_s30 = int_to_ptr.hbm [resolvable:$true] %s391_s30 }
  0x42   : > { %s2656_s21 = smov [#allocation14]   ;;  %s408_s1 = sshll.u32 %s3499_s10, 4  ;;  %s409_s1 = int_to_ptr.hbm [resolvable:$true] %s408_s1 }
  0x43   : > { %s393_s11 = sshll.u32 %s2656_s21, 4  ;;  %s2657_s18 = smov [#allocation15]   ;;  %s394_s11 = int_to_ptr.vmem [resolvable:$true] %s393_s11 }
  0x44   : > { %2247 = dma.hbm_to_vmem [thread:$0]  (!%p2766_p7), %s392_s30, 2048, %s394_s11, [#allocation13], %s3538_s12, %s3538_s12, %s3537_s26  }
  0x45   : > { %s410_s7 = sshll.u32 %s2657_s18, 4  ;;  %s436_s25 = scalar_lea.hbm %s3489_s0, %s2810_s19  ;;  %s411_s7 = int_to_ptr.vmem [resolvable:$true] %s410_s7 }
  0x46   : > { %s360_s3 = sshll.u32 %s3539_s5, 4  ;;  %s437_s21 = sshll.u32 %s436_s25, 4  ;;  %s361_s3 = int_to_ptr.hbm [resolvable:$true] %s360_s3  ;;  %s438_s21 = int_to_ptr.hbm [resolvable:$true] %s437_s21 }
  0x47   : > { %2241 = dma.hbm_to_vmem [thread:$0]  (!%p2766_p7), %s361_s3, 2048, %s363_s27, [#allocation10], %s3538_s12, %s3538_s12, %s3537_s26  }
  0x48   : > { %2250 = dma.hbm_to_vmem [thread:$0]  (!%p2766_p7), %s409_s1, 2048, %s411_s7, [#allocation16], %s3538_s12, %s3538_s12, %s3537_s26  }
  0x49   : > { %s431_s13 = scalar_lea.vmem [#allocation3], %s2818_s20  ;;  %s3540_s5 = sand.u32 1, %s2645_s23  }
  0x4a   : > { %s439_s24 = sshll.u32 %s431_s13, 4  ;;  %s428_s30 = scalar_lea.sflag [#allocation4], %s3540_s5  ;;  %s440_s24 = int_to_ptr.vmem [resolvable:$true] %s439_s24 }
  0x4b   : > { %s2507_s11 = sshra.s32 %s438_s21, 4  ;;  %s2514_s27 = scalar_lea.hbm %s3489_s0, 512  ;;  %s2508_s11 = int_to_ptr.hbm [resolvable:$true] %s2507_s11 }
  0x4c   : > { %s2509_s18 = scalar_lea.hbm %s2508_s11, 256  ;;  %p2515_p7 = scmp.lt.s32.totalorder %s2508_s11, %s3489_s0 }
  0x4d   : > { %p2510_p1 = scmp.ne.s32.totalorder %s2508_s11, %s2509_s18  ;;  %p2516_p11 = scmp.lt.s32.totalorder %s2514_s27, %s2509_s18 }
  0x4f   : > { %p2512_p8 = pnand %p2510_p1, %p2391_p9  ;;  %p2517_p13 = por %p2516_p11, %p2515_p7 }
  0x51   : > { %p2513_p10 = pneg %p2512_p8 }
  0x53   : > { %p2518_p3 = pnand %p2517_p13, %p2513_p10 }
  0x55   : > { %2521 = shalt.err (!%p2518_p3)
}
  0x56   : > { %2254 = dma.hbm_to_vmem [thread:$0]  (!%p2820_p2), %s438_s21, 4096, %s440_s24, %s428_s30, %s3538_s12, %s3538_s12, %s3537_s26  }
  0x57   : > { %s480_s13 = scalar_lea.hbm %s3491_s2, %s2810_s19  ;;  %s475_s3 = scalar_lea.vmem [#allocation8], %s2818_s20 }
  0x58   : > { %s481_s17 = sshll.u32 %s480_s13, 4  ;;  %s483_s11 = sshll.u32 %s475_s3, 4  ;;  %s482_s17 = int_to_ptr.hbm [resolvable:$true] %s481_s17  ;;  %s484_s11 = int_to_ptr.vmem [resolvable:$true] %s483_s11 }
  0x59   : > { %s2537_s18 = sshra.s32 %s482_s17, 4  ;;  %s2544_s21 = scalar_lea.hbm %s3491_s2, 512  ;;  %s2538_s18 = int_to_ptr.hbm [resolvable:$true] %s2537_s18 }
  0x5a   : > { %s2539_s27 = scalar_lea.hbm %s2538_s18, 256  ;;  %p2545_p10 = scmp.lt.s32.totalorder %s2538_s18, %s3491_s2 }
  0x5b   : > { %p2540_p5 = scmp.ne.s32.totalorder %s2538_s18, %s2539_s27  ;;  %p2546_p7 = scmp.lt.s32.totalorder %s2544_s21, %s2539_s27 }
  0x5d   : > { %p2542_p1 = pnand %p2540_p5, %p2391_p9  ;;  %p2547_p11 = por %p2546_p7, %p2545_p10 }
  0x5f   : > { %p2543_p8 = pneg %p2542_p1 }
  0x61   : > { %p2548_p13 = pnand %p2547_p11, %p2543_p8 }
  0x63   : > { %2551 = shalt.err (!%p2548_p13)
}
  0x64   : > { %2260 = dma.hbm_to_vmem [thread:$0]  (!%p2820_p2), %s482_s17, 4096, %s484_s11, %s2830_s15, %s3538_s12, %s3538_s12, %s3537_s26  }
  0x65   : > { %495 = sbr.rel (%p2754_p4) target bundleno = 1158 (0x486), region = 68  ;;  %s2917_s20 = sand.u32 (!%p2754_p4), 1, %s2641_s22  }
  0x66   : > { %s2143_s19 = sshll.u32 (!%p2754_p4), %s2917_s20, 8  ;;  %s498_s5 = scalar_lea.sflag (!%p2754_p4), [#allocation4], %s2917_s20 }
  0x67   : > { %s2921_s25 = scalar_lea.vmem (!%p2754_p4), [#allocation3], %s2143_s19 }
  0x6a   : > { %2612 = dma.done.wait (%p2803_p0), %s498_s5, 4096  }
  0x6b   : > { %2614 = vsyncadd (%p2803_p0), %s498_s5, 4294963200  ;;  %s507_s12 = sand.u32 1, %s2748_s28   ;;  %s2928_s15 = scalar_lea.vmem [#allocation6], %s2143_s19 }
  0x6c   : > { %s508_s29 = scalar_lea.sflag [#allocation7], %s507_s12 }
  0x6d   : > { %2616 = dma.done.wait (%p2803_p0), %s508_s29, 8192  }
  0x6e   : > { %2618 = vsyncadd (%p2803_p0), %s508_s29, 4294959104  ;;  %s2934_s14 = scalar_lea.vmem [#allocation8], %s2143_s19  ;;  %p3541_p4 = scmp.eq.s32.totalorder %s2748_s28, 0 }
  0x70   : > { %2620 = dma.done.wait (%p3541_p4), [#allocation10], 4096   ;;  %p3542_p2 = pmov %p3541_p4 }
  0x72   : > { %2622 = vsyncadd (%p3542_p2), [#allocation10], 4294963200  ;;  %p3543_p9 = pmov %p3542_p2 }
  0x73   : > { %p3544_p3 = pmov %p3542_p2 }
  0x74   : > { %2624 = dma.done.wait (%p3543_p9), [#allocation13], 4096  }
  0x75   : > { %2626 = vsyncadd (%p3544_p3), [#allocation13], 4294963200  ;;  %p3545_p5 = pmov %p3542_p2 }
  0x76   : > { %p3546_p1 = pmov %p3542_p2 }
  0x77   : > { %2628 = dma.done.wait (%p3545_p5), [#allocation16], 2048  }
  0x78   : > { %2630 = vsyncadd (%p3546_p1), [#allocation16], 4294965248  ;;  %v809_v0 = vld [vmem:[#allocation9 + $0x78] sm:$0xff]  ;;  %v808_v1 = vld [vmem:[#allocation9 + $0x70] sm:$0xff]  ;;  %s3547_s21 = sld [smem:[#allocation34_spill]]  ;;  %s2151_s19 = sshll.u32 %s2917_s20, 1 }
  0x79   : > { %814 = vmatpush.msra.mxu0 %v809_v0  ;;  %2159 = vmatpush.msra.mxu3 %v809_v0  ;;  %v807_v2 = vld [vmem:[#allocation9 + $0x68] sm:$0xff]  ;;  %v806_v3 = vld [vmem:[#allocation9 + $0x60] sm:$0xff]  ;;  %v805_v4 = vld [vmem:[#allocation9 + $0x58] sm:$0xff]  ;;  %s2153_s5 = sshll.u32 %s2748_s28, 1  ;;  %s3548_s29 = sld [smem:[#allocation35_spill]]  ;;  %vm1940_vm4 = vcmask 1040384  }
  0x7a   : > { %v804_v5 = vld [vmem:[#allocation9 + $0x50] sm:$0xff]  ;;  %v803_v6 = vld [vmem:[#allocation9 + $0x48] sm:$0xff]  ;;  %v802_v7 = vld [vmem:[#allocation9 + $0x40] sm:$0xff]  ;;  %s1949_s13 = scalar_lea.sflag [#allocation5], %s2917_s20 }
  0x7b   : > { %815 = vmatpush.msra.mxu0 %v808_v1  ;;  %2160 = vmatpush.msra.mxu3 %v808_v1  ;;  %v801_v8 = vld [vmem:[#allocation9 + $0x38] sm:$0xff]  ;;  %v800_v9 = vld [vmem:[#allocation9 + $0x30] sm:$0xff]  ;;  %v799_v10 = vld [vmem:[#allocation9 + $0x28] sm:$0xff] }
  0x7c   : > { %v798_v11 = vld [vmem:[#allocation9 + $0x20] sm:$0xff]  ;;  %v797_v12 = vld [vmem:[#allocation9 + $0x18] sm:$0xff]  ;;  %v796_v13 = vld [vmem:[#allocation9 + $0x10] sm:$0xff] }
  0x7d   : > { %816 = vmatpush.msra.mxu0 %v807_v2  ;;  %2161 = vmatpush.msra.mxu3 %v807_v2  ;;  %v795_v14 = vld [vmem:[#allocation9 + $0x8] sm:$0xff]  ;;  %v794_v15 = vld [vmem:[#allocation9] sm:$0xff]  ;;  %v693_v18 = vld [vmem:[%s2928_s15 + $0xd8] sm:$0xff] }
  0x7e   : > { %v602_v16 = vld [vmem:[%s2921_s25] sm:$0xff]  ;;  %v603_v17 = vld [vmem:[%s2921_s25 + $0x8] sm:$0xff]  ;;  %v604_v19 = vld [vmem:[%s2921_s25 + $0x10] sm:$0xff] }
  0x7f   : > { %817 = vmatpush.msra.mxu0 %v806_v3  ;;  %2162 = vmatpush.msra.mxu3 %v806_v3  ;;  %v694_v20 = vld [vmem:[%s2928_s15 + $0xe0] sm:$0xff]  ;;  %v605_v21 = vld [vmem:[%s2921_s25 + $0x18] sm:$0xff]  ;;  %v695_v22 = vld [vmem:[%s2928_s15 + $0xe8] sm:$0xff]  ;;  %s2587_s27 = scalar_lea.hbm %s3548_s29, 4 }
  0x80   : > { %v606_v23 = vld [vmem:[%s2921_s25 + $0x20] sm:$0xff]  ;;  %v696_v24 = vld [vmem:[%s2928_s15 + $0xf0] sm:$0xff]  ;;  %v607_v25 = vld [vmem:[%s2921_s25 + $0x28] sm:$0xff] }
  0x81   : > { %818 = vmatpush.msra.mxu0 %v805_v4  ;;  %2163 = vmatpush.msra.mxu3 %v805_v4  ;;  %v697_v26 = vld [vmem:[%s2928_s15 + $0xf8] sm:$0xff]  ;;  %v608_v27 = vld [vmem:[%s2921_s25 + $0x30] sm:$0xff]  ;;  %v610_v29 = vld [vmem:[%s2921_s25 + $0x40] sm:$0xff] }
  0x82   : > { %v609_v28 = vld [vmem:[%s2921_s25 + $0x38] sm:$0xff]  ;;  %v1101_v31 = vld [vmem:[#allocation11 + $0x70] sm:$0xff]  ;;  %v1100_v32 = vld [vmem:[#allocation11 + $0x68] sm:$0xff] }
  0x83   : > { %819 = vmatpush.msra.mxu0 %v804_v5  ;;  %2164 = vmatpush.msra.mxu3 %v804_v5  ;;  %v1102_v30 = vld [vmem:[#allocation11 + $0x78] sm:$0xff]  ;;  %v611_v33 = vld [vmem:[%s2921_s25 + $0x48] sm:$0xff]  ;;  %v1099_v34 = vld [vmem:[#allocation11 + $0x60] sm:$0xff] }
  0x84   : > { %1107 = vmatpush.msra.mxu1 %v1102_v30  ;;  %v1098_v35 = vld [vmem:[#allocation11 + $0x58] sm:$0xff]  ;;  %v1097_v36 = vld [vmem:[#allocation11 + $0x50] sm:$0xff]  ;;  %v1096_v37 = vld [vmem:[#allocation11 + $0x48] sm:$0xff] }
  0x85   : > { %820 = vmatpush.msra.mxu0 %v803_v6  ;;  %2165 = vmatpush.msra.mxu3 %v803_v6  ;;  %v612_v38 = vld [vmem:[%s2921_s25 + $0x50] sm:$0xff]  ;;  %v1095_v39 = vld [vmem:[#allocation11 + $0x40] sm:$0xff]  ;;  %v1094_v40 = vld [vmem:[#allocation11 + $0x38] sm:$0xff] }
  0x86   : > { %1108 = vmatpush.msra.mxu1 %v1101_v31  ;;  %v1093_v41 = vld [vmem:[#allocation11 + $0x30] sm:$0xff]  ;;  %v1092_v42 = vld [vmem:[#allocation11 + $0x28] sm:$0xff]  ;;  %v613_v43 = vld [vmem:[%s2921_s25 + $0x58] sm:$0xff] }
  0x87   : > { %821 = vmatpush.msra.mxu0 %v802_v7  ;;  %2166 = vmatpush.msra.mxu3 %v802_v7  ;;  %v1091_v44 = vld [vmem:[#allocation11 + $0x20] sm:$0xff]  ;;  %v1090_v45 = vld [vmem:[#allocation11 + $0x18] sm:$0xff]  ;;  %v1089_v46 = vld [vmem:[#allocation11 + $0x10] sm:$0xff] }
  0x88   : > { %1109 = vmatpush.msra.mxu1 %v1100_v32  ;;  %v614_v47 = vld [vmem:[%s2921_s25 + $0x60] sm:$0xff]  ;;  %v1088_v48 = vld [vmem:[#allocation11 + $0x8] sm:$0xff]  ;;  %v616_v51 = vld [vmem:[%s2921_s25 + $0x70] sm:$0xff] }
  0x89   : > { %822 = vmatpush.msra.mxu0 %v801_v8  ;;  %2167 = vmatpush.msra.mxu3 %v801_v8  ;;  %v1087_v49 = vld [vmem:[#allocation11] sm:$0xff]  ;;  %v615_v50 = vld [vmem:[%s2921_s25 + $0x68] sm:$0xff]  ;;  %v1379_v52 = vld [vmem:[#allocation14 + $0x78] sm:$0xff] }
  0x8a   : > { %1110 = vmatpush.msra.mxu1 %v1099_v34  ;;  %v617_v53 = vld [vmem:[%s2921_s25 + $0x78] sm:$0xff]  ;;  %1380 = vmatpush.msra.mxu2 %v1379_v52  ;;  %v1378_v54 = vld [vmem:[#allocation14 + $0x70] sm:$0xff]  ;;  %v1377_v55 = vld [vmem:[#allocation14 + $0x68] sm:$0xff] }
  0x8b   : > { %823 = vmatpush.msra.mxu0 %v800_v9  ;;  %2168 = vmatpush.msra.mxu3 %v800_v9  ;;  %v2972_v56 = vld [vmem:[%s3493_s4] ss:$0 sm:$0xff]  ;;  %v1375_v58 = vld [vmem:[#allocation14 + $0x58] sm:$0xff]  ;;  %v1374_v62 = vld [vmem:[#allocation14 + $0x50] sm:$0xff] }
  0x8c   : > { %1111 = vmatpush.msra.mxu1 %v1098_v35  ;;  %1381 = vmatpush.msra.mxu2 %v1378_v54  ;;  %v1376_v57 = vld [vmem:[#allocation14 + $0x60] sm:$0xff]  ;;  %v1373_v0 = vld [vmem:[#allocation14 + $0x48] sm:$0xff]  ;;  %v1371_v2 = vld [vmem:[#allocation14 + $0x38] sm:$0xff] }
  0x8d   : > { %824 = vmatpush.msra.mxu0 %v799_v10  ;;  %2169 = vmatpush.msra.mxu3 %v799_v10  ;;  %v618_v60 = vld [vmem:[%s2921_s25 + $0x80] sm:$0xff]  ;;  %v619_v4 = vld [vmem:[%s2921_s25 + $0x88] sm:$0xff]  ;;  %v1370_v6 = vld [vmem:[#allocation14 + $0x30] sm:$0xff] }
  0x8e   : > { %1112 = vmatpush.msra.mxu1 %v1097_v36  ;;  %1382 = vmatpush.msra.mxu2 %v1377_v55  ;;  %v1372_v1 = vld [vmem:[#allocation14 + $0x40] sm:$0xff]  ;;  %v1369_v8 = vld [vmem:[#allocation14 + $0x28] sm:$0xff]  ;;  %v1367_v10 = vld [vmem:[#allocation14 + $0x18] sm:$0xff] }
  0x8f   : > { %825 = vmatpush.msra.mxu0 %v798_v11  ;;  %2170 = vmatpush.msra.mxu3 %v798_v11  ;;  %v1368_v9 = vld [vmem:[#allocation14 + $0x20] sm:$0xff] }
  0x90   : > { %1113 = vmatpush.msra.mxu1 %v1096_v37  ;;  %1383 = vmatpush.msra.mxu2 %v1376_v57 }
  0x91   : > { %826 = vmatpush.msra.mxu0 %v797_v12  ;;  %2171 = vmatpush.msra.mxu3 %v797_v12  ;;  %v620_v12 = vld [vmem:[%s2921_s25 + $0x90] sm:$0xff] }
  0x92   : > { %1114 = vmatpush.msra.mxu1 %v1095_v39  ;;  %1384 = vmatpush.msra.mxu2 %v1375_v58 }
  0x93   : > { %827 = vmatpush.msra.mxu0 %v796_v13  ;;  %2172 = vmatpush.msra.mxu3 %v796_v13 }
  0x94   : > { %1115 = vmatpush.msra.mxu1 %v1094_v40  ;;  %1385 = vmatpush.msra.mxu2 %v1374_v62 }
  0x95   : > { %828 = vmatpush.msra.mxu0 %v795_v14  ;;  %2173 = vmatpush.msra.mxu3 %v795_v14 }
  0x96   : > { %1116 = vmatpush.msra.mxu1 %v1093_v41  ;;  %1386 = vmatpush.msra.mxu2 %v1373_v0 }
  0x97   : > { %829 = vmatpush.msra.mxu0 %v794_v15  ;;  %2174 = vmatpush.msra.mxu3 %v794_v15 }
  0x98   : > { %830 = vmatmul.f32.vlgmr.msra.gmra.mxu0 %v602_v16  ;;  %1007 = vmatmul.f32.vlgmr.msra.gmra.mxu3 %v693_v18  ;;  %v1366_v16 = vld [vmem:[#allocation14 + $0x10] sm:$0xff] }
  0x99   : > { %2175 = vmatpush.msrb.mxu3 %v1102_v30  ;;  %1117 = vmatpush.msra.mxu1 %v1092_v42 }
  0x9a   : > { %1387 = vmatpush.msra.mxu2 %v1372_v1 }
  0x9b   : > { %2176 = vmatpush.msrb.mxu3 %v1101_v31  ;;  %1118 = vmatpush.msra.mxu1 %v1091_v44  ;;  %v622_v31 = vld [vmem:[%s2921_s25 + $0xa0] sm:$0xff] }
  0x9c   : > { %1388 = vmatpush.msra.mxu2 %v1371_v2 }
  0x9d   : > { %2177 = vmatpush.msrb.mxu3 %v1100_v32  ;;  %1119 = vmatpush.msra.mxu1 %v1090_v45 }
  0x9e   : > { %1389 = vmatpush.msra.mxu2 %v1370_v6 }
  0x9f   : > { %2178 = vmatpush.msrb.mxu3 %v1099_v34  ;;  %1120 = vmatpush.msra.mxu1 %v1089_v46 }
  0xa0   : > { %833 = vmatmul.f32.gmra.mxu0 %v603_v17  ;;  %1010 = vmatmul.f32.gmra.mxu3 %v694_v20  ;;  %v1364_v20 = vld [vmem:[#allocation14] sm:$0xff] }
  0xa1   : > { %2179 = vmatpush.msrb.mxu3 %v1098_v35  ;;  %1121 = vmatpush.msra.mxu1 %v1088_v48 }
  0xa2   : > { %1390 = vmatpush.msra.mxu2 %v1369_v8 }
  0xa3   : > { %2180 = vmatpush.msrb.mxu3 %v1097_v36  ;;  %1122 = vmatpush.msra.mxu1 %v1087_v49 }
  0xa4   : > { %1391 = vmatpush.msra.mxu2 %v1368_v9 }
  0xa5   : > { %2181 = vmatpush.msrb.mxu3 %v1096_v37  ;;  %v1334_v37 = vld [vmem:[%s2934_s14 + $0x10] sm:$0xff] }
  0xa6   : > { %1392 = vmatpush.msra.mxu2 %v1367_v10 }
  0xa7   : > { %2182 = vmatpush.msrb.mxu3 %v1095_v39  ;;  %v623_v39 = vld [vmem:[%s2921_s25 + $0xa8] sm:$0xff] }
  0xa8   : > { %836 = vmatmul.f32.gmra.mxu0 %v604_v19  ;;  %1013 = vmatmul.f32.gmra.mxu3 %v695_v22  ;;  %v1365_v19 = vld [vmem:[#allocation14 + $0x8] sm:$0xff] }
  0xa9   : > { %2183 = vmatpush.msrb.mxu3 %v1094_v40  ;;  %1393 = vmatpush.msra.mxu2 %v1366_v16 }
  0xab   : > { %2184 = vmatpush.msrb.mxu3 %v1093_v41  ;;  %1394 = vmatpush.msra.mxu2 %v1365_v19 }
  0xad   : > { %2185 = vmatpush.msrb.mxu3 %v1092_v42  ;;  %1395 = vmatpush.msra.mxu2 %v1364_v20 }
  0xaf   : > { %2186 = vmatpush.msrb.mxu3 %v1091_v44 }
  0xb0   : > { %839 = vmatmul.f32.gmra.mxu0 %v605_v21  ;;  %1016 = vmatmul.f32.gmra.mxu3 %v696_v24  ;;  %v1332_v21 = vld [vmem:[%s2934_s14] sm:$0xff] }
  0xb1   : > { %2187 = vmatpush.msrb.mxu3 %v1090_v45  ;;  %1396 = vmatmul.f32.vlgmr.msra.gmra.mxu2 %v1332_v21  ;;  %v1335_v45 = vld [vmem:[%s2934_s14 + $0x18] sm:$0xff]  ;;  %v1362_v21 = vld [vmem:[%s2934_s14 + $0xf0] sm:$0xff] }
  0xb3   : > { %2188 = vmatpush.msrb.mxu3 %v1089_v46 }
  0xb5   : > { %2189 = vmatpush.msrb.mxu3 %v1088_v48 }
  0xb7   : > { %2190 = vmatpush.msrb.mxu3 %v1087_v49 }
  0xb8   : > { %842 = vmatmul.f32.gmra.mxu0 %v606_v23  ;;  %1019 = vmatmul.f32.gmra.mxu3 %v697_v26  ;;  %v621_v23 = vld [vmem:[%s2921_s25 + $0x98] sm:$0xff] }
  0xb9   : > { %2191 = vmatpush.msra.mxu3 %v1379_v52 }
  0xbb   : > { %2192 = vmatpush.msra.mxu3 %v1378_v54 }
  0xbd   : > { %2193 = vmatpush.msra.mxu3 %v1377_v55  ;;  %v625_v55 = vld [vmem:[%s2921_s25 + $0xb8] sm:$0xff] }
  0xbf   : > { %2194 = vmatpush.msra.mxu3 %v1376_v57 }
  0xc0   : > { %845 = vmatmul.f32.gmra.mxu0 %v607_v25 }
  0xc1   : > { %2195 = vmatpush.msra.mxu3 %v1375_v58 }
  0xc3   : > { %2196 = vmatpush.msra.mxu3 %v1374_v62  ;;  %v626_v62 = vld [vmem:[%s2921_s25 + $0xc0] sm:$0xff] }
  0xc5   : > { %2197 = vmatpush.msra.mxu3 %v1373_v0 }
  0xc7   : > { %2198 = vmatpush.msra.mxu3 %v1372_v1  ;;  %v1360_v1 = vld [vmem:[%s2934_s14 + $0xe0] sm:$0xff] }
  0xc8   : > { %848 = vmatmul.f32.gmra.mxu0 %v608_v27 }
  0xc9   : > { %2199 = vmatpush.msra.mxu3 %v1371_v2  ;;  %v1331_v2 = vld [vmem:[#allocation12 + $0x78] sm:$0xff] }
  0xcb   : > { %2200 = vmatpush.msra.mxu3 %v1370_v6  ;;  %v627_v6 = vld [vmem:[%s2921_s25 + $0xc8] sm:$0xff] }
  0xcd   : > { %2201 = vmatpush.msra.mxu3 %v1369_v8  ;;  %v1329_v8 = vld [vmem:[#allocation12 + $0x68] sm:$0xff] }
  0xcf   : > { %2202 = vmatpush.msra.mxu3 %v1368_v9 }
  0xd0   : > { %851 = vmatmul.f32.gmra.mxu0 %v609_v28 }
  0xd1   : > { %2203 = vmatpush.msra.mxu3 %v1367_v10  ;;  %v1328_v10 = vld [vmem:[#allocation12 + $0x60] sm:$0xff] }
  0xd3   : > { %2204 = vmatpush.msra.mxu3 %v1366_v16  ;;  %v628_v16 = vld [vmem:[%s2921_s25 + $0xd0] sm:$0xff] }
  0xd5   : > { %2205 = vmatpush.msra.mxu3 %v1365_v19 }
  0xd7   : > { %2206 = vmatpush.msra.mxu3 %v1364_v20  ;;  %v1324_v20 = vld [vmem:[#allocation12 + $0x40] sm:$0xff] }
  0xd8   : > { %854 = vmatmul.f32.gmra.mxu0 %v610_v29  ;;  %v1333_v29 = vld [vmem:[%s2934_s14 + $0x8] sm:$0xff] }
  0xd9   : > { %1399 = vmatmul.f32.gmra.mxu2 %v1333_v29 }
  0xe0   : > { %857 = vmatmul.f32.gmra.mxu0 %v611_v33 }
  0xe1   : > { %1402 = vmatmul.f32.gmra.mxu2 %v1334_v37 }
  0xe8   : > { %860 = vmatmul.f32.gmra.mxu0 %v612_v38 }
  0xe9   : > { %1405 = vmatmul.f32.gmra.mxu2 %v1335_v45 }
  0xf0   : > { %863 = vmatmul.f32.gmra.mxu0 %v613_v43 }
  0xf8   : > { %866 = vmatmul.f32.gmra.mxu0 %v614_v47  ;;  %v624_v47 = vld [vmem:[%s2921_s25 + $0xb0] sm:$0xff] }
 0x100   : > { %869 = vmatmul.f32.gmra.mxu0 %v615_v50 }
 0x108   : > { %872 = vmatmul.f32.gmra.mxu0 %v616_v51 }
 0x110   : > { %875 = vmatmul.f32.gmra.mxu0 %v617_v53  ;;  %v1336_v53 = vld [vmem:[%s2934_s14 + $0x20] sm:$0xff] }
 0x111   : > { %1408 = vmatmul.f32.gmra.mxu2 %v1336_v53  ;;  %v1344_v53 = vld [vmem:[%s2934_s14 + $0x60] sm:$0xff] }
 0x115   : > { %v831_v59 = vpop.f32.mrf.mxu0 }
 0x116   : > { %v832_v61 = vadd.f32 %v2972_v56, %v831_v59  ;;  %v1359_v59 = vld [vmem:[%s2934_s14 + $0xd8] sm:$0xff] }
 0x118   : > { %878 = vmatmul.f32.gmra.mxu0 %v618_v60  ;;  %v1023_v63 = vmax.f32 %v832_v61, 0.0  ;;  %v1337_v60 = vld [vmem:[%s2934_s14 + $0x28] sm:$0xff] }
 0x119   : > { %1411 = vmatmul.f32.gmra.mxu2 %v1337_v60  ;;  %v1345_v60 = vld [vmem:[%s2934_s14 + $0x68] sm:$0xff] }
 0x11a   : > { %1123 = vmatmul.f32.vlgmr.msra.gmra.mxu1 %v1023_v63 }
 0x11b   : > { %v1008_v13 = vpop.f32.mrf.mxu3 }
 0x11c   : > { %v1009_v15 = vadd.f32 %v2972_v56, %v1008_v13  ;;  %v1339_v13 = vld [vmem:[%s2934_s14 + $0x38] sm:$0xff] }
 0x11d   : > { %v834_v3 = vpop.f32.mrf.mxu0 }
 0x11e   : > { %v835_v5 = vadd.f32 %v2972_v56, %v834_v3  ;;  %v1082_v18 = vmax.f32 %v1009_v15, 0.0  ;;  %v1338_v3 = vld [vmem:[%s2934_s14 + $0x30] sm:$0xff] }
 0x120   : > { %881 = vmatmul.f32.gmra.mxu0 %v619_v4  ;;  %v1024_v7 = vmax.f32 %v835_v5, 0.0  ;;  %1300 = vmatmul.f32.vlgmr.msrb.gmra.mxu3 %v1082_v18  ;;  %v1330_v4 = vld [vmem:[#allocation12 + $0x70] sm:$0xff]  ;;  %v1325_v18 = vld [vmem:[#allocation12 + $0x48] sm:$0xff] }
 0x121   : > { %1493 = vmatpush.msrb.mxu3 %v1331_v2  ;;  %1414 = vmatmul.f32.gmra.mxu2 %v1338_v3 }
 0x122   : > { %1126 = vmatmul.f32.gmra.mxu1 %v1024_v7 }
 0x123   : > { %v1011_v24 = vpop.f32.mrf.mxu3  ;;  %1494 = vmatpush.msrb.mxu3 %v1330_v4  ;;  %v1346_v4 = vld [vmem:[%s2934_s14 + $0x70] sm:$0xff] }
 0x124   : > { %v1012_v26 = vadd.f32 %v2972_v56, %v1011_v24  ;;  %v1322_v24 = vld [vmem:[#allocation12 + $0x30] sm:$0xff] }
 0x125   : > { %v837_v11 = vpop.f32.mrf.mxu0  ;;  %1495 = vmatpush.msrb.mxu3 %v1329_v8  ;;  %v1686_v8 = vld [vmem:[#allocation15 + $0x60] sm:$0xff] }
 0x126   : > { %v838_v14 = vadd.f32 %v2972_v56, %v837_v11  ;;  %v1083_v28 = vmax.f32 %v1012_v26, 0.0  ;;  %v1361_v11 = vld [vmem:[%s2934_s14 + $0xe8] sm:$0xff]  ;;  %v629_v26 = vld [vmem:[%s2921_s25 + $0xd8] sm:$0xff] }
 0x127   : > { %1496 = vmatpush.msrb.mxu3 %v1328_v10 }
 0x128   : > { %884 = vmatmul.f32.gmra.mxu0 %v620_v12  ;;  %v1025_v17 = vmax.f32 %v838_v14, 0.0  ;;  %1303 = vmatmul.f32.gmra.mxu3 %v1083_v28  ;;  %v1327_v12 = vld [vmem:[#allocation12 + $0x58] sm:$0xff]  ;;  %v1326_v14 = vld [vmem:[#allocation12 + $0x50] sm:$0xff]  ;;  %v1321_v28 = vld [vmem:[#allocation12 + $0x28] sm:$0xff] }
 0x129   : > { %1497 = vmatpush.msrb.mxu3 %v1327_v12  ;;  %1417 = vmatmul.f32.gmra.mxu2 %v1339_v13  ;;  %v1347_v12 = vld [vmem:[%s2934_s14 + $0x78] sm:$0xff] }
 0x12a   : > { %1129 = vmatmul.f32.gmra.mxu1 %v1025_v17 }
 0x12b   : > { %v1014_v32 = vpop.f32.mrf.mxu3  ;;  %1498 = vmatpush.msrb.mxu3 %v1326_v14  ;;  %v668_v14 = vld [vmem:[%s2928_s15 + $0x10] sm:$0xff] }
 0x12c   : > { %v1015_v34 = vadd.f32 %v2972_v56, %v1014_v32  ;;  %v1319_v32 = vld [vmem:[#allocation12 + $0x18] sm:$0xff] }
 0x12d   : > { %v840_v22 = vpop.f32.mrf.mxu0  ;;  %1499 = vmatpush.msrb.mxu3 %v1325_v18 }
 0x12e   : > { %v841_v25 = vadd.f32 %v2972_v56, %v840_v22  ;;  %v1084_v36 = vmax.f32 %v1015_v34, 0.0  ;;  %v1323_v22 = vld [vmem:[#allocation12 + $0x38] sm:$0xff]  ;;  %v1318_v34 = vld [vmem:[#allocation12 + $0x10] sm:$0xff] }
 0x12f   : > { %1500 = vmatpush.msrb.mxu3 %v1324_v20  ;;  %v1348_v20 = vld [vmem:[%s2934_s14 + $0x80] sm:$0xff] }
 0x130   : > { %887 = vmatmul.f32.gmra.mxu0 %v621_v23  ;;  %v1026_v27 = vmax.f32 %v841_v25, 0.0  ;;  %1306 = vmatmul.f32.gmra.mxu3 %v1084_v36  ;;  %v1340_v23 = vld [vmem:[%s2934_s14 + $0x40] sm:$0xff] }
 0x131   : > { %1501 = vmatpush.msrb.mxu3 %v1323_v22  ;;  %1420 = vmatmul.f32.gmra.mxu2 %v1340_v23  ;;  %v630_v36 = vld [vmem:[%s2921_s25 + $0xe0] sm:$0xff]  ;;  %v669_v22 = vld [vmem:[%s2928_s15 + $0x18] sm:$0xff] }
 0x132   : > { %1132 = vmatmul.f32.gmra.mxu1 %v1026_v27 }
 0x133   : > { %v1017_v40 = vpop.f32.mrf.mxu3  ;;  %1502 = vmatpush.msrb.mxu3 %v1322_v24 }
 0x134   : > { %v1018_v42 = vadd.f32 %v2972_v56, %v1017_v40 }
 0x135   : > { %v843_v30 = vpop.f32.mrf.mxu0  ;;  %1503 = vmatpush.msrb.mxu3 %v1321_v28  ;;  %v1349_v28 = vld [vmem:[%s2934_s14 + $0x88] sm:$0xff] }
 0x136   : > { %v844_v33 = vadd.f32 %v2972_v56, %v843_v30  ;;  %v1085_v44 = vmax.f32 %v1018_v42, 0.0  ;;  %v1320_v30 = vld [vmem:[#allocation12 + $0x20] sm:$0xff]  ;;  %v1342_v42 = vld [vmem:[%s2934_s14 + $0x50] sm:$0xff] }
 0x137   : > { %1504 = vmatpush.msrb.mxu3 %v1320_v30  ;;  %v670_v30 = vld [vmem:[%s2928_s15 + $0x20] sm:$0xff] }
 0x138   : > { %890 = vmatmul.f32.gmra.mxu0 %v622_v31  ;;  %v1027_v35 = vmax.f32 %v844_v33, 0.0  ;;  %1309 = vmatmul.f32.gmra.mxu3 %v1085_v44  ;;  %v1363_v31 = vld [vmem:[%s2934_s14 + $0xf8] sm:$0xff]  ;;  %v1341_v33 = vld [vmem:[%s2934_s14 + $0x48] sm:$0xff] }
 0x139   : > { %1505 = vmatpush.msrb.mxu3 %v1319_v32  ;;  %1423 = vmatmul.f32.gmra.mxu2 %v1341_v33  ;;  %v631_v44 = vld [vmem:[%s2921_s25 + $0xe8] sm:$0xff] }
 0x13a   : > { %1135 = vmatmul.f32.gmra.mxu1 %v1027_v35 }
 0x13b   : > { %v1020_v48 = vpop.f32.mrf.mxu3  ;;  %1506 = vmatpush.msrb.mxu3 %v1318_v34 }
 0x13c   : > { %v1021_v50 = vadd.f32 %v2972_v56, %v1020_v48  ;;  %v1343_v48 = vld [vmem:[%s2934_s14 + $0x58] sm:$0xff] }
 0x13d   : > { %v846_v38 = vpop.f32.mrf.mxu0 }
 0x13e   : > { %v847_v41 = vadd.f32 %v2972_v56, %v846_v38  ;;  %v1086_v52 = vmax.f32 %v1021_v50, 0.0  ;;  %v1689_v38 = vld [vmem:[#allocation15 + $0x78] sm:$0xff]  ;;  %v632_v50 = vld [vmem:[%s2921_s25 + $0xf0] sm:$0xff] }
 0x13f   : > { %1694 = vmatpush.msrb.mxu2 %v1689_v38  ;;  %v1350_v38 = vld [vmem:[%s2934_s14 + $0x90] sm:$0xff] }
 0x140   : > { %893 = vmatmul.f32.gmra.mxu0 %v623_v39  ;;  %v1028_v43 = vmax.f32 %v847_v41, 0.0  ;;  %1312 = vmatmul.f32.gmra.mxu3 %v1086_v52  ;;  %v1317_v39 = vld [vmem:[#allocation12 + $0x8] sm:$0xff]  ;;  %v1316_v41 = vld [vmem:[#allocation12] sm:$0xff] }
 0x141   : > { %1507 = vmatpush.msrb.mxu3 %v1317_v39  ;;  %1426 = vmatmul.f32.gmra.mxu2 %v1342_v42 }
 0x142   : > { %1138 = vmatmul.f32.gmra.mxu1 %v1028_v43 }
 0x143   : > { %1508 = vmatpush.msrb.mxu3 %v1316_v41 }
 0x145   : > { %v849_v46 = vpop.f32.mrf.mxu0 }
 0x146   : > { %v850_v49 = vadd.f32 %v2972_v56, %v849_v46 }
 0x148   : > { %896 = vmatmul.f32.gmra.mxu0 %v624_v47  ;;  %v1029_v51 = vmax.f32 %v850_v49, 0.0  ;;  %1477 = vmatmul.f32.vlgmr.msra.gmra.mxu3 %v1359_v59  ;;  %v1688_v47 = vld [vmem:[#allocation15 + $0x70] sm:$0xff] }
 0x149   : > { %1695 = vmatpush.msrb.mxu2 %v1688_v47  ;;  %v1351_v47 = vld [vmem:[%s2934_s14 + $0x98] sm:$0xff] }
 0x14a   : > { %1141 = vmatmul.f32.gmra.mxu1 %v1029_v51  ;;  %1429 = vmatmul.f32.gmra.mxu2 %v1343_v48 }
 0x14d   : > { %v852_v54 = vpop.f32.mrf.mxu0 }
 0x14e   : > { %v853_v57 = vadd.f32 %v2972_v56, %v852_v54 }
 0x150   : > { %899 = vmatmul.f32.gmra.mxu0 %v625_v55  ;;  %v1030_v58 = vmax.f32 %v853_v57, 0.0  ;;  %1480 = vmatmul.f32.gmra.mxu3 %v1360_v1  ;;  %v633_v55 = vld [vmem:[%s2921_s25 + $0xf8] sm:$0xff] }
 0x152   : > { %1144 = vmatmul.f32.gmra.mxu1 %v1030_v58  ;;  %1432 = vmatmul.f32.gmra.mxu2 %v1344_v53  ;;  %v1687_v58 = vld [vmem:[#allocation15 + $0x68] sm:$0xff] }
 0x153   : > { %1696 = vmatpush.msrb.mxu2 %v1687_v58 }
 0x155   : > { %v855_v61 = vpop.f32.mrf.mxu0  ;;  %1697 = vmatpush.msrb.mxu2 %v1686_v8 }
 0x156   : > { %v856_v63 = vadd.f32 %v2972_v56, %v855_v61  ;;  %v3033_v61 = vld [vmem:[%s3495_s6] ss:$0 sm:$0xff] }
 0x158   : > { %902 = vmatmul.f32.gmra.mxu0 %v626_v62  ;;  %v1031_v0 = vmax.f32 %v856_v63, 0.0  ;;  %1483 = vmatmul.f32.gmra.mxu3 %v1361_v11  ;;  %v666_v63 = vld [vmem:[%s2928_s15] sm:$0xff] }
 0x15a   : > { %1147 = vmatmul.f32.gmra.mxu1 %v1031_v0  ;;  %1435 = vmatmul.f32.gmra.mxu2 %v1345_v60  ;;  %v673_v60 = vld [vmem:[%s2928_s15 + $0x38] sm:$0xff] }
 0x15d   : > { %v858_v5 = vpop.f32.mrf.mxu0 }
 0x15e   : > { %v859_v7 = vadd.f32 %v2972_v56, %v858_v5 }
 0x160   : > { %905 = vmatmul.f32.gmra.mxu0 %v627_v6  ;;  %v1032_v9 = vmax.f32 %v859_v7, 0.0  ;;  %1486 = vmatmul.f32.gmra.mxu3 %v1362_v21  ;;  %v667_v6 = vld [vmem:[%s2928_s15 + $0x8] sm:$0xff] }
 0x162   : > { %1150 = vmatmul.f32.gmra.mxu1 %v1032_v9  ;;  %1438 = vmatmul.f32.gmra.mxu2 %v1346_v4  ;;  %v1682_v4 = vld [vmem:[#allocation15 + $0x40] sm:$0xff] }
 0x165   : > { %v861_v15 = vpop.f32.mrf.mxu0 }
 0x166   : > { %v862_v17 = vadd.f32 %v2972_v56, %v861_v15 }
 0x168   : > { %908 = vmatmul.f32.gmra.mxu0 %v628_v16  ;;  %v1033_v19 = vmax.f32 %v862_v17, 0.0  ;;  %1489 = vmatmul.f32.gmra.mxu3 %v1363_v31 }
 0x16a   : > { %1153 = vmatmul.f32.gmra.mxu1 %v1033_v19  ;;  %1441 = vmatmul.f32.gmra.mxu2 %v1347_v12  ;;  %v1685_v19 = vld [vmem:[#allocation15 + $0x58] sm:$0xff] }
 0x16b   : > { %1698 = vmatpush.msrb.mxu2 %v1685_v19 }
 0x16d   : > { %v864_v25 = vpop.f32.mrf.mxu0 }
 0x16e   : > { %v865_v27 = vadd.f32 %v2972_v56, %v864_v25  ;;  %v3049_v25 = vpop.f32.mrf.mxu2 }
 0x170   : > { %911 = vmatmul.f32.gmra.mxu0 %v629_v26  ;;  %v1034_v29 = vmax.f32 %v865_v27, 0.0 }
 0x172   : > { %1156 = vmatmul.f32.gmra.mxu1 %v1034_v29  ;;  %1444 = vmatmul.f32.gmra.mxu2 %v1348_v20 }
 0x175   : > { %v867_v35 = vpop.f32.mrf.mxu0 }
 0x176   : > { %v868_v37 = vadd.f32 %v2972_v56, %v867_v35  ;;  %v3055_v33 = vpop.f32.mrf.mxu2 }
 0x178   : > { %914 = vmatmul.f32.gmra.mxu0 %v630_v36  ;;  %v1035_v40 = vmax.f32 %v868_v37, 0.0  ;;  %v1684_v37 = vld [vmem:[#allocation15 + $0x50] sm:$0xff] }
 0x179   : > { %1699 = vmatpush.msrb.mxu2 %v1684_v37  ;;  %v677_v37 = vld [vmem:[%s2928_s15 + $0x58] sm:$0xff] }
 0x17a   : > { %1159 = vmatmul.f32.gmra.mxu1 %v1035_v40  ;;  %1447 = vmatmul.f32.gmra.mxu2 %v1349_v28  ;;  %v671_v40 = vld [vmem:[%s2928_s15 + $0x28] sm:$0xff] }
 0x17d   : > { %v870_v43 = vpop.f32.mrf.mxu0 }
 0x17e   : > { %v871_v45 = vadd.f32 %v2972_v56, %v870_v43  ;;  %v3063_v43 = vpop.f32.mrf.mxu2 }
 0x180   : > { %917 = vmatmul.f32.gmra.mxu0 %v631_v44  ;;  %v1036_v46 = vmax.f32 %v871_v45, 0.0 }
 0x182   : > { %1162 = vmatmul.f32.gmra.mxu1 %v1036_v46  ;;  %1450 = vmatmul.f32.gmra.mxu2 %v1350_v38 }
 0x185   : > { %v873_v49 = vpop.f32.mrf.mxu0 }
 0x186   : > { %v874_v51 = vadd.f32 %v2972_v56, %v873_v49  ;;  %v672_v49 = vld [vmem:[%s2928_s15 + $0x30] sm:$0xff] }
 0x188   : > { %920 = vmatmul.f32.gmra.mxu0 %v632_v50  ;;  %v1037_v52 = vmax.f32 %v874_v51, 0.0 }
 0x18a   : > { %1165 = vmatmul.f32.gmra.mxu1 %v1037_v52  ;;  %1453 = vmatmul.f32.gmra.mxu2 %v1351_v47  ;;  %v3071_v52 = vpop.f32.mrf.mxu2 }
 0x18d   : > { %v876_v54 = vpop.f32.mrf.mxu0 }
 0x18e   : > { %v877_v57 = vadd.f32 %v2972_v56, %v876_v54 }
 0x190   : > { %923 = vmatmul.f32.gmra.mxu0 %v633_v55  ;;  %v1038_v59 = vmax.f32 %v877_v57, 0.0  ;;  %v1683_v55 = vld [vmem:[#allocation15 + $0x48] sm:$0xff]  ;;  %v1352_v57 = vld [vmem:[%s2934_s14 + $0xa0] sm:$0xff] }
 0x191   : > { %1700 = vmatpush.msrb.mxu2 %v1683_v55 }
 0x192   : > { %1168 = vmatmul.f32.gmra.mxu1 %v1038_v59  ;;  %1456 = vmatmul.f32.gmra.mxu2 %v1352_v57  ;;  %v1679_v57 = vld [vmem:[#allocation15 + $0x28] sm:$0xff] }
 0x193   : > { %1701 = vmatpush.msrb.mxu2 %v1682_v4  ;;  %v1676_v4 = vld [vmem:[#allocation15 + $0x10] sm:$0xff] }
 0x195   : > { %v879_v62 = vpop.f32.mrf.mxu0 }
 0x196   : > { %v880_v0 = vadd.f32 %v2972_v56, %v879_v62 }
 0x197   : > { %v1124_v1 = vpop.f32.mrf.mxu1 }
 0x198   : > { %v1125_v2 = vadd.f32 %v3033_v61, %v1124_v1  ;;  %v1039_v3 = vmax.f32 %v880_v0, 0.0  ;;  %926 = vmatmul.f32.gmra.mxu0 %v666_v63  ;;  %v3079_v0 = vpop.f32.mrf.mxu2 }
 0x19a   : > { %1171 = vmatmul.f32.gmra.mxu1 %v1039_v3  ;;  %1509 = vmatmul.f32.vlgmr.msrb.gmra.mxu3 %v1125_v2  ;;  %v1353_v3 = vld [vmem:[%s2934_s14 + $0xa8] sm:$0xff] }
 0x19b   : > { %1459 = vmatmul.f32.gmra.mxu2 %v1353_v3 }
 0x19d   : > { %v882_v5 = vpop.f32.mrf.mxu0 }
 0x19e   : > { %v883_v7 = vadd.f32 %v2972_v56, %v882_v5 }
 0x19f   : > { %v1127_v9 = vpop.f32.mrf.mxu1 }
 0x1a0   : > { %v1040_v10 = vmax.f32 %v883_v7, 0.0  ;;  %v1128_v11 = vadd.f32 %v3033_v61, %v1127_v9  ;;  %929 = vmatmul.f32.gmra.mxu0 %v667_v6  ;;  %v674_v6 = vld [vmem:[%s2928_s15 + $0x40] sm:$0xff] }
 0x1a2   : > { %1174 = vmatmul.f32.gmra.mxu1 %v1040_v10  ;;  %1512 = vmatmul.f32.gmra.mxu3 %v1128_v11  ;;  %v3087_v10 = vpop.f32.mrf.mxu2 }
 0x1a3   : > { %v3058_v36 = vpop.f32.mrf.mxu3 }
 0x1a5   : > { %v885_v13 = vpop.f32.mrf.mxu0 }
 0x1a6   : > { %v886_v15 = vadd.f32 %v2972_v56, %v885_v13  ;;  %v1354_v13 = vld [vmem:[%s2934_s14 + $0xb0] sm:$0xff] }
 0x1a7   : > { %v1130_v16 = vpop.f32.mrf.mxu1  ;;  %1462 = vmatmul.f32.gmra.mxu2 %v1354_v13 }
 0x1a8   : > { %v1041_v17 = vmax.f32 %v886_v15, 0.0  ;;  %v1131_v18 = vadd.f32 %v3033_v61, %v1130_v16  ;;  %932 = vmatmul.f32.gmra.mxu0 %v668_v14  ;;  %v675_v15 = vld [vmem:[%s2928_s15 + $0x48] sm:$0xff] }
 0x1aa   : > { %1177 = vmatmul.f32.gmra.mxu1 %v1041_v17  ;;  %1515 = vmatmul.f32.gmra.mxu3 %v1131_v18  ;;  %v3093_v18 = vpop.f32.mrf.mxu2 }
 0x1ab   : > { %v3066_v46 = vpop.f32.mrf.mxu3 }
 0x1ad   : > { %v888_v21 = vpop.f32.mrf.mxu0 }
 0x1ae   : > { %v889_v23 = vadd.f32 %v2972_v56, %v888_v21 }
 0x1af   : > { %v1133_v24 = vpop.f32.mrf.mxu1 }
 0x1b0   : > { %v1042_v26 = vmax.f32 %v889_v23, 0.0  ;;  %v1134_v27 = vadd.f32 %v3033_v61, %v1133_v24  ;;  %935 = vmatmul.f32.gmra.mxu0 %v669_v22  ;;  %v1681_v22 = vld [vmem:[#allocation15 + $0x38] sm:$0xff] }
 0x1b1   : > { %1702 = vmatpush.msrb.mxu2 %v1681_v22  ;;  %v1355_v23 = vld [vmem:[%s2934_s14 + $0xb8] sm:$0xff] }
 0x1b2   : > { %1180 = vmatmul.f32.gmra.mxu1 %v1042_v26  ;;  %1518 = vmatmul.f32.gmra.mxu3 %v1134_v27  ;;  %v676_v26 = vld [vmem:[%s2928_s15 + $0x50] sm:$0xff] }
 0x1b3   : > { %v3075_v58 = vpop.f32.mrf.mxu3  ;;  %1465 = vmatmul.f32.gmra.mxu2 %v1355_v23 }
 0x1b5   : > { %v891_v29 = vpop.f32.mrf.mxu0 }
 0x1b6   : > { %v892_v31 = vadd.f32 %v2972_v56, %v891_v29  ;;  %v3101_v29 = vpop.f32.mrf.mxu2 }
 0x1b7   : > { %v1136_v32 = vpop.f32.mrf.mxu1 }
 0x1b8   : > { %v1043_v34 = vmax.f32 %v892_v31, 0.0  ;;  %v1137_v35 = vadd.f32 %v3033_v61, %v1136_v32  ;;  %938 = vmatmul.f32.gmra.mxu0 %v670_v30 }
 0x1ba   : > { %1183 = vmatmul.f32.gmra.mxu1 %v1043_v34  ;;  %1521 = vmatmul.f32.gmra.mxu3 %v1137_v35  ;;  %v1356_v34 = vld [vmem:[%s2934_s14 + $0xc0] sm:$0xff] }
 0x1bb   : > { %v3085_v8 = vpop.f32.mrf.mxu3  ;;  %1468 = vmatmul.f32.gmra.mxu2 %v1356_v34 }
 0x1bd   : > { %v894_v39 = vpop.f32.mrf.mxu0 }
 0x1be   : > { %v895_v41 = vadd.f32 %v2972_v56, %v894_v39 }
 0x1bf   : > { %v1139_v42 = vpop.f32.mrf.mxu1 }
 0x1c0   : > { %v1044_v44 = vmax.f32 %v895_v41, 0.0  ;;  %v1140_v45 = vadd.f32 %v3033_v61, %v1139_v42  ;;  %941 = vmatmul.f32.gmra.mxu0 %v671_v40  ;;  %v3109_v40 = vpop.f32.mrf.mxu2 }
 0x1c2   : > { %1186 = vmatmul.f32.gmra.mxu1 %v1044_v44  ;;  %1524 = vmatmul.f32.gmra.mxu3 %v1140_v45  ;;  %v1680_v44 = vld [vmem:[#allocation15 + $0x30] sm:$0xff]  ;;  %v1357_v45 = vld [vmem:[%s2934_s14 + $0xc8] sm:$0xff] }
 0x1c3   : > { %v3096_v21 = vpop.f32.mrf.mxu3  ;;  %1703 = vmatpush.msrb.mxu2 %v1680_v44 }
 0x1c4   : > { %1471 = vmatmul.f32.gmra.mxu2 %v1357_v45  ;;  %v3150_v45 = vld [vmem:[%s3498_s9] ss:$0 sm:$0xff] }
 0x1c5   : > { %v897_v48 = vpop.f32.mrf.mxu0  ;;  %1704 = vmatpush.msrb.mxu2 %v1679_v57 }
 0x1c6   : > { %v898_v50 = vadd.f32 %v2972_v56, %v897_v48 }
 0x1c7   : > { %v1142_v51 = vpop.f32.mrf.mxu1 }
 0x1c8   : > { %v1045_v53 = vmax.f32 %v898_v50, 0.0  ;;  %v1143_v54 = vadd.f32 %v3033_v61, %v1142_v51  ;;  %944 = vmatmul.f32.gmra.mxu0 %v672_v49  ;;  %v678_v49 = vld [vmem:[%s2928_s15 + $0x60] sm:$0xff] }
 0x1ca   : > { %1189 = vmatmul.f32.gmra.mxu1 %v1045_v53  ;;  %1527 = vmatmul.f32.gmra.mxu3 %v1143_v54  ;;  %v3117_v53 = vpop.f32.mrf.mxu2 }
 0x1cb   : > { %v3104_v32 = vpop.f32.mrf.mxu3 }
 0x1cd   : > { %v900_v59 = vpop.f32.mrf.mxu0 }
 0x1ce   : > { %v901_v62 = vadd.f32 %v2972_v56, %v900_v59  ;;  %v1678_v59 = vld [vmem:[#allocation15 + $0x20] sm:$0xff] }
 0x1cf   : > { %v1145_v63 = vpop.f32.mrf.mxu1  ;;  %1705 = vmatpush.msrb.mxu2 %v1678_v59 }
 0x1d0   : > { %v1046_v1 = vmax.f32 %v901_v62, 0.0  ;;  %v1146_v2 = vadd.f32 %v3033_v61, %v1145_v63  ;;  %947 = vmatmul.f32.gmra.mxu0 %v673_v60  ;;  %v1358_v60 = vld [vmem:[%s2934_s14 + $0xd0] sm:$0xff]  ;;  %v1677_v62 = vld [vmem:[#allocation15 + $0x18] sm:$0xff]  ;;  %s597_s14 = scalar_lea.vmem [#allocation17], %s2151_s19 }
 0x1d1   : > { %1474 = vmatmul.f32.gmra.mxu2 %v1358_v60  ;;  %s1961_s28 = sshll.u32 %s597_s14, 4  ;;  %s1962_s28 = int_to_ptr.vmem [resolvable:$true] %s1961_s28 }
 0x1d2   : > { %1192 = vmatmul.f32.gmra.mxu1 %v1046_v1  ;;  %1530 = vmatmul.f32.gmra.mxu3 %v1146_v2  ;;  %v679_v1 = vld [vmem:[%s2928_s15 + $0x68] sm:$0xff] }
 0x1d3   : > { %v3113_v47 = vpop.f32.mrf.mxu3  ;;  %1706 = vmatpush.msrb.mxu2 %v1677_v62 }
 0x1d5   : > { %v903_v5 = vpop.f32.mrf.mxu0  ;;  %1707 = vmatpush.msrb.mxu2 %v1676_v4  ;;  %v684_v4 = vld [vmem:[%s2928_s15 + $0x90] sm:$0xff] }
 0x1d6   : > { %v904_v7 = vadd.f32 %v2972_v56, %v903_v5 }
 0x1d7   : > { %v1148_v9 = vpop.f32.mrf.mxu1 }
 0x1d8   : > { %v1047_v11 = vmax.f32 %v904_v7, 0.0  ;;  %v1149_v12 = vadd.f32 %v3033_v61, %v1148_v9  ;;  %950 = vmatmul.f32.gmra.mxu0 %v674_v6  ;;  %v3125_v6 = vpop.f32.mrf.mxu2 }
 0x1da   : > { %1195 = vmatmul.f32.gmra.mxu1 %v1047_v11  ;;  %1533 = vmatmul.f32.gmra.mxu3 %v1149_v12  ;;  %v1675_v11 = vld [vmem:[#allocation15 + $0x8] sm:$0xff]  ;;  %v1674_v12 = vld [vmem:[#allocation15] sm:$0xff] }
 0x1db   : > { %v3123_v3 = vpop.f32.mrf.mxu3  ;;  %1708 = vmatpush.msrb.mxu2 %v1675_v11 }
 0x1dd   : > { %v906_v14 = vpop.f32.mrf.mxu0  ;;  %1709 = vmatpush.msrb.mxu2 %v1674_v12 }
 0x1de   : > { %v907_v16 = vadd.f32 %v2972_v56, %v906_v14  ;;  %v680_v14 = vld [vmem:[%s2928_s15 + $0x70] sm:$0xff] }
 0x1df   : > { %v1151_v17 = vpop.f32.mrf.mxu1 }
 0x1e0   : > { %v1048_v19 = vmax.f32 %v907_v16, 0.0  ;;  %v1152_v20 = vadd.f32 %v3033_v61, %v1151_v17  ;;  %953 = vmatmul.f32.gmra.mxu0 %v675_v15  ;;  %v3130_v17 = vpop.f32.mrf.mxu2 }
 0x1e2   : > { %1198 = vmatmul.f32.gmra.mxu1 %v1048_v19  ;;  %1536 = vmatmul.f32.gmra.mxu3 %v1152_v20 }
 0x1e3   : > { %v3133_v22 = vpop.f32.mrf.mxu3 }
 0x1e5   : > { %v909_v24 = vpop.f32.mrf.mxu0 }
 0x1e6   : > { %v910_v27 = vadd.f32 %v2972_v56, %v909_v24  ;;  %v681_v24 = vld [vmem:[%s2928_s15 + $0x78] sm:$0xff] }
 0x1e7   : > { %v1154_v28 = vpop.f32.mrf.mxu1 }
 0x1e8   : > { %v1049_v30 = vmax.f32 %v910_v27, 0.0  ;;  %v1155_v31 = vadd.f32 %v3033_v61, %v1154_v28  ;;  %956 = vmatmul.f32.gmra.mxu0 %v676_v26 }
 0x1ea   : > { %1201 = vmatmul.f32.gmra.mxu1 %v1049_v30  ;;  %1539 = vmatmul.f32.gmra.mxu3 %v1155_v31  ;;  %v3138_v31 = vpop.f32.mrf.mxu2 }
 0x1eb   : > { %v3140_v34 = vpop.f32.mrf.mxu3 }
 0x1ed   : > { %v912_v35 = vpop.f32.mrf.mxu0 }
 0x1ee   : > { %v913_v38 = vadd.f32 %v2972_v56, %v912_v35 }
 0x1ef   : > { %v1157_v39 = vpop.f32.mrf.mxu1 }
 0x1f0   : > { %v1050_v41 = vmax.f32 %v913_v38, 0.0  ;;  %v1158_v42 = vadd.f32 %v3033_v61, %v1157_v39  ;;  %959 = vmatmul.f32.gmra.mxu0 %v677_v37  ;;  %v682_v37 = vld [vmem:[%s2928_s15 + $0x80] sm:$0xff] }
 0x1f2   : > { %1204 = vmatmul.f32.gmra.mxu1 %v1050_v41  ;;  %1542 = vmatmul.f32.gmra.mxu3 %v1158_v42  ;;  %v3145_v44 = vpop.f32.mrf.mxu2 }
 0x1f5   : > { %v915_v48 = vpop.f32.mrf.mxu0 }
 0x1f6   : > { %v916_v50 = vadd.f32 %v2972_v56, %v915_v48 }
 0x1f7   : > { %v1160_v51 = vpop.f32.mrf.mxu1 }
 0x1f8   : > { %v1051_v54 = vmax.f32 %v916_v50, 0.0  ;;  %v1161_v55 = vadd.f32 %v3033_v61, %v1160_v51  ;;  %962 = vmatmul.f32.gmra.mxu0 %v678_v49  ;;  %v683_v50 = vld [vmem:[%s2928_s15 + $0x88] sm:$0xff] }
 0x1fa   : > { %1207 = vmatmul.f32.gmra.mxu1 %v1051_v54  ;;  %1545 = vmatmul.f32.gmra.mxu3 %v1161_v55 }
 0x1fd   : > { %v918_v63 = vpop.f32.mrf.mxu0 }
 0x1fe   : > { %v919_v2 = vadd.f32 %v2972_v56, %v918_v63  ;;  %v3157_v63 = vpop.f32.mrf.mxu2 }
 0x1ff   : > { %v1163_v5 = vpop.f32.mrf.mxu1 }
 0x200   : > { %v1052_v7 = vmax.f32 %v919_v2, 0.0  ;;  %v1164_v9 = vadd.f32 %v3033_v61, %v1163_v5  ;;  %965 = vmatmul.f32.gmra.mxu0 %v679_v1 }
 0x202   : > { %1210 = vmatmul.f32.gmra.mxu1 %v1052_v7  ;;  %1548 = vmatmul.f32.gmra.mxu3 %v1164_v9 }
 0x205   : > { %v921_v13 = vpop.f32.mrf.mxu0 }
 0x206   : > { %v922_v15 = vadd.f32 %v2972_v56, %v921_v13 }
 0x207   : > { %v1166_v16 = vpop.f32.mrf.mxu1 }
 0x208   : > { %v1053_v19 = vmax.f32 %v922_v15, 0.0  ;;  %v1167_v20 = vadd.f32 %v3033_v61, %v1166_v16  ;;  %968 = vmatmul.f32.gmra.mxu0 %v680_v14  ;;  %v685_v16 = vld [vmem:[%s2928_s15 + $0x98] sm:$0xff] }
 0x20a   : > { %1213 = vmatmul.f32.gmra.mxu1 %v1053_v19  ;;  %1551 = vmatmul.f32.gmra.mxu3 %v1167_v20  ;;  %v3167_v20 = vpop.f32.mrf.mxu2 }
 0x20d   : > { %v924_v23 = vpop.f32.mrf.mxu0 }
 0x20e   : > { %v925_v26 = vadd.f32 %v2972_v56, %v924_v23 }
 0x20f   : > { %v1169_v27 = vpop.f32.mrf.mxu1 }
 0x210   : > { %v1054_v28 = vmax.f32 %v925_v26, 0.0  ;;  %v1170_v30 = vadd.f32 %v3033_v61, %v1169_v27  ;;  %971 = vmatmul.f32.gmra.mxu0 %v681_v24 }
 0x212   : > { %1216 = vmatmul.f32.gmra.mxu1 %v1054_v28  ;;  %1554 = vmatmul.f32.gmra.mxu3 %v1170_v30 }
 0x215   : > { %v927_v35 = vpop.f32.mrf.mxu0 }
 0x216   : > { %v928_v38 = vadd.f32 %v2972_v56, %v927_v35 }
 0x217   : > { %v1172_v39 = vpop.f32.mrf.mxu1 }
 0x218   : > { %v1173_v41 = vadd.f32 %v3033_v61, %v1172_v39  ;;  %v1055_v42 = vmax.f32 %v928_v38, 0.0  ;;  %974 = vmatmul.f32.gmra.mxu0 %v682_v37  ;;  %v686_v37 = vld [vmem:[%s2928_s15 + $0xa0] sm:$0xff] }
 0x21a   : > { %1557 = vmatmul.f32.gmra.mxu3 %v1173_v41  ;;  %1219 = vmatmul.f32.gmra.mxu1 %v1055_v42 }
 0x21d   : > { %v1510_v48 = vpop.f32.mrf.mxu3  ;;  %v930_v49 = vpop.f32.mrf.mxu0 }
 0x21e   : > { %v1511_v51 = vadd.f32 %v1510_v48, %v3049_v25  ;;  %v931_v54 = vadd.f32 %v2972_v56, %v930_v49  ;;  %v3176_v49 = vpop.f32.mrf.mxu2 }
 0x21f   : > { %v1175_v55 = vpop.f32.mrf.mxu1 }
 0x220   : > { %v1610_v57 = vadd.f32 %v3150_v45, %v1511_v51  ;;  %v1176_v59 = vadd.f32 %v3033_v61, %v1175_v55  ;;  %v1056_v60 = vmax.f32 %v931_v54, 0.0  ;;  %977 = vmatmul.f32.gmra.mxu0 %v683_v50  ;;  %v687_v55 = vld [vmem:[%s2928_s15 + $0xa8] sm:$0xff] }
 0x222   : > { %v1642_v62 = vmax.f32 %v1610_v57, 0.0  ;;  %1560 = vmatmul.f32.gmra.mxu3 %v1176_v59  ;;  %1222 = vmatmul.f32.gmra.mxu1 %v1056_v60 }
 0x224   : > { %1710 = vmatmul.f32.vlgmr.msrb.gmra.mxu2 %v1642_v62 }
 0x225   : > { %v1513_v1 = vpop.f32.mrf.mxu3  ;;  %v933_v2 = vpop.f32.mrf.mxu0 }
 0x226   : > { %v1514_v25 = vadd.f32 %v1513_v1, %v3055_v33  ;;  %v934_v5 = vadd.f32 %v2972_v56, %v933_v2 }
 0x227   : > { %v1178_v7 = vpop.f32.mrf.mxu1 }
 0x228   : > { %v1611_v9 = vadd.f32 %v3150_v45, %v1514_v25  ;;  %v1179_v11 = vadd.f32 %v3033_v61, %v1178_v7  ;;  %v1057_v12 = vmax.f32 %v934_v5, 0.0  ;;  %980 = vmatmul.f32.gmra.mxu0 %v684_v4  ;;  %v3188_v4 = vpop.f32.mrf.mxu2  ;;  %v688_v5 = vld [vmem:[%s2928_s15 + $0xb0] sm:$0xff] }
 0x22a   : > { %1563 = vmatmul.f32.gmra.mxu3 %v1179_v11  ;;  %v1643_v13 = vmax.f32 %v1611_v9, 0.0  ;;  %1225 = vmatmul.f32.gmra.mxu1 %v1057_v12 }
 0x22c   : > { %1713 = vmatmul.f32.gmra.mxu2 %v1643_v13 }
 0x22d   : > { %v1516_v14 = vpop.f32.mrf.mxu3  ;;  %v936_v15 = vpop.f32.mrf.mxu0 }
 0x22e   : > { %v1517_v19 = vadd.f32 %v1516_v14, %v3063_v43  ;;  %v937_v33 = vadd.f32 %v2972_v56, %v936_v15 }
 0x22f   : > { %v1181_v23 = vpop.f32.mrf.mxu1 }
 0x230   : > { %v1612_v24 = vadd.f32 %v3150_v45, %v1517_v19  ;;  %v1182_v26 = vadd.f32 %v3033_v61, %v1181_v23  ;;  %v1058_v27 = vmax.f32 %v937_v33, 0.0  ;;  %983 = vmatmul.f32.gmra.mxu0 %v685_v16  ;;  %v3195_v16 = vpop.f32.mrf.mxu2  ;;  %v689_v23 = vld [vmem:[%s2928_s15 + $0xb8] sm:$0xff] }
 0x232   : > { %1566 = vmatmul.f32.gmra.mxu3 %v1182_v26  ;;  %v1644_v28 = vmax.f32 %v1612_v24, 0.0  ;;  %1228 = vmatmul.f32.gmra.mxu1 %v1058_v27 }
 0x234   : > { %1716 = vmatmul.f32.gmra.mxu2 %v1644_v28 }
 0x235   : > { %v1519_v30 = vpop.f32.mrf.mxu3  ;;  %v939_v35 = vpop.f32.mrf.mxu0 }
 0x236   : > { %v1520_v43 = vadd.f32 %v1519_v30, %v3071_v52  ;;  %v940_v38 = vadd.f32 %v2972_v56, %v939_v35  ;;  %v3183_v56 = vld [vmem:[%s3493_s4] ss:$0 sm:$0xff] }
 0x237   : > { %v1184_v39 = vpop.f32.mrf.mxu1 }
 0x238   : > { %v1613_v41 = vadd.f32 %v3150_v45, %v1520_v43  ;;  %v1185_v42 = vadd.f32 %v3033_v61, %v1184_v39  ;;  %v1059_v48 = vmax.f32 %v940_v38, 0.0  ;;  %986 = vmatmul.f32.gmra.mxu0 %v686_v37  ;;  %v690_v38 = vld [vmem:[%s2928_s15 + $0xc0] sm:$0xff] }
 0x23a   : > { %1569 = vmatmul.f32.gmra.mxu3 %v1185_v42  ;;  %v1645_v50 = vmax.f32 %v1613_v41, 0.0  ;;  %1231 = vmatmul.f32.gmra.mxu1 %v1059_v48  ;;  %v3205_v41 = vpop.f32.mrf.mxu2 }
 0x23c   : > { %1719 = vmatmul.f32.gmra.mxu2 %v1645_v50 }
 0x23d   : > { %v1522_v51 = vpop.f32.mrf.mxu3  ;;  %v942_v54 = vpop.f32.mrf.mxu0 }
 0x23e   : > { %v1523_v52 = vadd.f32 %v1522_v51, %v3079_v0  ;;  %v943_v57 = vadd.f32 %v3183_v56, %v942_v54 }
 0x23f   : > { %v1187_v59 = vpop.f32.mrf.mxu1 }
 0x240   : > { %v1614_v60 = vadd.f32 %v3150_v45, %v1523_v52  ;;  %v1188_v62 = vadd.f32 %v3033_v61, %v1187_v59  ;;  %v1060_v1 = vmax.f32 %v943_v57, 0.0  ;;  %989 = vmatmul.f32.gmra.mxu0 %v687_v55  ;;  %v691_v57 = vld [vmem:[%s2928_s15 + $0xc8] sm:$0xff] }
 0x242   : > { %1572 = vmatmul.f32.gmra.mxu3 %v1188_v62  ;;  %v1646_v2 = vmax.f32 %v1614_v60, 0.0  ;;  %1234 = vmatmul.f32.gmra.mxu1 %v1060_v1 }
 0x244   : > { %1722 = vmatmul.f32.gmra.mxu2 %v1646_v2 }
 0x245   : > { %v1525_v0 = vpop.f32.mrf.mxu3  ;;  %v945_v25 = vpop.f32.mrf.mxu0 }
 0x246   : > { %v1526_v7 = vadd.f32 %v1525_v0, %v3087_v10  ;;  %v946_v9 = vadd.f32 %v3183_v56, %v945_v25  ;;  %v3214_v0 = vpop.f32.mrf.mxu2 }
 0x247   : > { %v1190_v11 = vpop.f32.mrf.mxu1 }
 0x248   : > { %v1615_v12 = vadd.f32 %v3150_v45, %v1526_v7  ;;  %v1191_v13 = vadd.f32 %v3033_v61, %v1190_v11  ;;  %v1061_v14 = vmax.f32 %v946_v9, 0.0  ;;  %992 = vmatmul.f32.gmra.mxu0 %v688_v5  ;;  %v692_v9 = vld [vmem:[%s2928_s15 + $0xd0] sm:$0xff]  ;;  %s1959_s15 = scalar_lea.hbm %s3548_s29, %s2153_s5 }
 0x249   : > { %s1963_s26 = sshll.u32 %s1959_s15, 4  ;;  %s1964_s26 = int_to_ptr.hbm [resolvable:$true] %s1963_s26 }
 0x24a   : > { %1575 = vmatmul.f32.gmra.mxu3 %v1191_v13  ;;  %v1647_v15 = vmax.f32 %v1615_v12, 0.0  ;;  %1237 = vmatmul.f32.gmra.mxu1 %v1061_v14  ;;  %s2581_s17 = sshra.s32 %s1964_s26, 4  ;;  %s2582_s17 = int_to_ptr.hbm [resolvable:$true] %s2581_s17 }
 0x24b   : > { %s2583_s3 = scalar_lea.hbm %s2582_s17, 2  ;;  %p2588_p7 = scmp.lt.s32.totalorder %s2582_s17, %s3548_s29 }
 0x24c   : > { %1725 = vmatmul.f32.gmra.mxu2 %v1647_v15  ;;  %p2584_p0 = scmp.ne.s32.totalorder %s2582_s17, %s2583_s3  ;;  %p2589_p11 = scmp.lt.s32.totalorder %s2587_s27, %s2583_s3 }
 0x24d   : > { %v1528_v19 = vpop.f32.mrf.mxu3  ;;  %v948_v33 = vpop.f32.mrf.mxu0 }
 0x24e   : > { %v1529_v10 = vadd.f32 %v1528_v19, %v3093_v18  ;;  %v949_v24 = vadd.f32 %v3183_v56, %v948_v33  ;;  %v3221_v33 = vpop.f32.mrf.mxu2  ;;  %p2585_p8 = pnand %p2584_p0, %p2794_p12  ;;  %p2590_p13 = por %p2589_p11, %p2588_p7 }
 0x24f   : > { %v1193_v26 = vpop.f32.mrf.mxu1 }
 0x250   : > { %v1616_v27 = vadd.f32 %v3150_v45, %v1529_v10  ;;  %v1194_v28 = vadd.f32 %v3033_v61, %v1193_v26  ;;  %v1062_v30 = vmax.f32 %v949_v24, 0.0  ;;  %995 = vmatmul.f32.gmra.mxu0 %v689_v23  ;;  %p2586_p10 = pneg %p2585_p8 }
 0x252   : > { %1578 = vmatmul.f32.gmra.mxu3 %v1194_v28  ;;  %v1648_v35 = vmax.f32 %v1616_v27, 0.0  ;;  %1240 = vmatmul.f32.gmra.mxu1 %v1062_v30  ;;  %p2591_p4 = pnand %p2590_p13, %p2586_p10 }
 0x254   : > { %1728 = vmatmul.f32.gmra.mxu2 %v1648_v35 }
 0x255   : > { %v1531_v37 = vpop.f32.mrf.mxu3  ;;  %v951_v43 = vpop.f32.mrf.mxu0 }
 0x256   : > { %v1532_v39 = vadd.f32 %v1531_v37, %v3101_v29  ;;  %v952_v18 = vadd.f32 %v3183_v56, %v951_v43  ;;  %v3227_v37 = vpop.f32.mrf.mxu2 }
 0x257   : > { %v1196_v42 = vpop.f32.mrf.mxu1 }
 0x258   : > { %v1617_v48 = vadd.f32 %v3150_v45, %v1532_v39  ;;  %v1197_v50 = vadd.f32 %v3033_v61, %v1196_v42  ;;  %v1063_v51 = vmax.f32 %v952_v18, 0.0  ;;  %998 = vmatmul.f32.gmra.mxu0 %v690_v38 }
 0x25a   : > { %1581 = vmatmul.f32.gmra.mxu3 %v1197_v50  ;;  %v1649_v54 = vmax.f32 %v1617_v48, 0.0  ;;  %1243 = vmatmul.f32.gmra.mxu1 %v1063_v51 }
 0x25c   : > { %1731 = vmatmul.f32.gmra.mxu2 %v1649_v54 }
 0x25d   : > { %v1534_v55 = vpop.f32.mrf.mxu3  ;;  %v954_v52 = vpop.f32.mrf.mxu0 }
 0x25e   : > { %v1535_v29 = vadd.f32 %v1534_v55, %v3109_v40  ;;  %v955_v59 = vadd.f32 %v3183_v56, %v954_v52 }
 0x25f   : > { %v1199_v60 = vpop.f32.mrf.mxu1 }
 0x260   : > { %v1618_v62 = vadd.f32 %v3150_v45, %v1535_v29  ;;  %v1200_v1 = vadd.f32 %v3033_v61, %v1199_v60  ;;  %v1064_v2 = vmax.f32 %v955_v59, 0.0  ;;  %1001 = vmatmul.f32.gmra.mxu0 %v691_v57  ;;  %v3234_v57 = vpop.f32.mrf.mxu2 }
 0x262   : > { %1584 = vmatmul.f32.gmra.mxu3 %v1200_v1  ;;  %v1650_v25 = vmax.f32 %v1618_v62, 0.0  ;;  %1246 = vmatmul.f32.gmra.mxu1 %v1064_v2 }
 0x264   : > { %1734 = vmatmul.f32.gmra.mxu2 %v1650_v25 }
 0x265   : > { %v1537_v5 = vpop.f32.mrf.mxu3  ;;  %v957_v7 = vpop.f32.mrf.mxu0 }
 0x266   : > { %v1538_v40 = vadd.f32 %v1537_v5, %v3117_v53  ;;  %v958_v11 = vadd.f32 %v3183_v56, %v957_v7 }
 0x267   : > { %v1202_v12 = vpop.f32.mrf.mxu1 }
 0x268   : > { %v1619_v13 = vadd.f32 %v3150_v45, %v1538_v40  ;;  %v1203_v14 = vadd.f32 %v3033_v61, %v1202_v12  ;;  %v1065_v15 = vmax.f32 %v958_v11, 0.0  ;;  %1004 = vmatmul.f32.gmra.mxu0 %v692_v9  ;;  %v3243_v11 = vpop.f32.mrf.mxu2 }
 0x26a   : > { %1587 = vmatmul.f32.gmra.mxu3 %v1203_v14  ;;  %v1651_v19 = vmax.f32 %v1619_v13, 0.0  ;;  %1249 = vmatmul.f32.gmra.mxu1 %v1065_v15 }
 0x26c   : > { %1737 = vmatmul.f32.gmra.mxu2 %v1651_v19 }
 0x26d   : > { %v1540_v23 = vpop.f32.mrf.mxu3  ;;  %v960_v10 = vpop.f32.mrf.mxu0 }
 0x26e   : > { %v1541_v24 = vadd.f32 %v1540_v23, %v3125_v6  ;;  %v961_v53 = vadd.f32 %v3183_v56, %v960_v10 }
 0x26f   : > { %v1205_v26 = vpop.f32.mrf.mxu1 }
 0x270   : > { %v1620_v27 = vadd.f32 %v3150_v45, %v1541_v24  ;;  %v1206_v28 = vadd.f32 %v3033_v61, %v1205_v26  ;;  %v1066_v30 = vmax.f32 %v961_v53, 0.0 }
 0x272   : > { %v1652_v35 = vmax.f32 %v1620_v27, 0.0  ;;  %1590 = vmatmul.f32.gmra.mxu3 %v1206_v28  ;;  %1252 = vmatmul.f32.gmra.mxu1 %v1066_v30  ;;  %v3249_v27 = vpop.f32.mrf.mxu2 }
 0x274   : > { %1740 = vmatmul.f32.gmra.mxu2 %v1652_v35 }
 0x275   : > { %v1543_v43 = vpop.f32.mrf.mxu3  ;;  %v963_v38 = vpop.f32.mrf.mxu0 }
 0x276   : > { %v1544_v39 = vadd.f32 %v1543_v43, %v3130_v17  ;;  %v964_v6 = vadd.f32 %v3183_v56, %v963_v38 }
 0x277   : > { %v1208_v18 = vpop.f32.mrf.mxu1 }
 0x278   : > { %v1621_v42 = vadd.f32 %v3150_v45, %v1544_v39  ;;  %v1209_v48 = vadd.f32 %v3033_v61, %v1208_v18  ;;  %v1067_v50 = vmax.f32 %v964_v6, 0.0 }
 0x27a   : > { %v1653_v51 = vmax.f32 %v1621_v42, 0.0  ;;  %1593 = vmatmul.f32.gmra.mxu3 %v1209_v48  ;;  %1255 = vmatmul.f32.gmra.mxu1 %v1067_v50  ;;  %v3256_v18 = vpop.f32.mrf.mxu2 }
 0x27c   : > { %1743 = vmatmul.f32.gmra.mxu2 %v1653_v51 }
 0x27d   : > { %v1546_v54 = vpop.f32.mrf.mxu3  ;;  %v966_v55 = vpop.f32.mrf.mxu0 }
 0x27e   : > { %v1547_v52 = vadd.f32 %v1546_v54, %v3138_v31  ;;  %v967_v17 = vadd.f32 %v3183_v56, %v966_v55 }
 0x27f   : > { %v1211_v29 = vpop.f32.mrf.mxu1 }
 0x280   : > { %v1622_v59 = vadd.f32 %v3150_v45, %v1547_v52  ;;  %v1212_v60 = vadd.f32 %v3033_v61, %v1211_v29  ;;  %v1068_v62 = vmax.f32 %v967_v17, 0.0 }
 0x282   : > { %v1654_v1 = vmax.f32 %v1622_v59, 0.0  ;;  %1596 = vmatmul.f32.gmra.mxu3 %v1212_v60  ;;  %1258 = vmatmul.f32.gmra.mxu1 %v1068_v62 }
 0x284   : > { %1746 = vmatmul.f32.gmra.mxu2 %v1654_v1 }
 0x285   : > { %v1549_v2 = vpop.f32.mrf.mxu3  ;;  %v969_v25 = vpop.f32.mrf.mxu0 }
 0x286   : > { %v1550_v5 = vadd.f32 %v1549_v2, %v3145_v44  ;;  %v970_v31 = vadd.f32 %v3183_v56, %v969_v25 }
 0x287   : > { %v1214_v7 = vpop.f32.mrf.mxu1 }
 0x288   : > { %v1623_v9 = vadd.f32 %v3150_v45, %v1550_v5  ;;  %v1215_v40 = vadd.f32 %v3033_v61, %v1214_v7  ;;  %v1069_v12 = vmax.f32 %v970_v31, 0.0 }
 0x28a   : > { %v1655_v13 = vmax.f32 %v1623_v9, 0.0  ;;  %1599 = vmatmul.f32.gmra.mxu3 %v1215_v40  ;;  %1261 = vmatmul.f32.gmra.mxu1 %v1069_v12 }
 0x28c   : > { %1749 = vmatmul.f32.gmra.mxu2 %v1655_v13 }
 0x28d   : > { %v1552_v14 = vpop.f32.mrf.mxu3  ;;  %v972_v15 = vpop.f32.mrf.mxu0 }
 0x28e   : > { %v1553_v19 = vadd.f32 %v1552_v14, %v3157_v63  ;;  %v973_v44 = vadd.f32 %v3183_v56, %v972_v15 }
 0x28f   : > { %v1217_v23 = vpop.f32.mrf.mxu1 }
 0x290   : > { %v1624_v10 = vadd.f32 %v3150_v45, %v1553_v19  ;;  %v1218_v24 = vadd.f32 %v3033_v61, %v1217_v23  ;;  %v1070_v53 = vmax.f32 %v973_v44, 0.0 }
 0x292   : > { %v1656_v26 = vmax.f32 %v1624_v10, 0.0  ;;  %1602 = vmatmul.f32.gmra.mxu3 %v1218_v24  ;;  %1264 = vmatmul.f32.gmra.mxu1 %v1070_v53 }
 0x294   : > { %1752 = vmatmul.f32.gmra.mxu2 %v1656_v26 }
 0x295   : > { %v1555_v28 = vpop.f32.mrf.mxu3  ;;  %v975_v30 = vpop.f32.mrf.mxu0 }
 0x296   : > { %v1556_v35 = vadd.f32 %v1555_v28, %v3167_v20  ;;  %v976_v63 = vadd.f32 %v3183_v56, %v975_v30 }
 0x297   : > { %v3253_v43 = vpop.f32.mrf.mxu1 }
 0x298   : > { %v1625_v38 = vadd.f32 %v3150_v45, %v1556_v35  ;;  %v1071_v39 = vmax.f32 %v976_v63, 0.0  ;;  %v3283_v35 = vld [vmem:[%s3547_s21] ss:$0 sm:$0xff] }
 0x29a   : > { %v1657_v6 = vmax.f32 %v1625_v38, 0.0  ;;  %1267 = vmatmul.f32.gmra.mxu1 %v1071_v39 }
 0x29c   : > { %1755 = vmatmul.f32.gmra.mxu2 %v1657_v6 }
 0x29d   : > { %v1558_v42 = vpop.f32.mrf.mxu3  ;;  %v978_v48 = vpop.f32.mrf.mxu0 }
 0x29e   : > { %v1559_v50 = vadd.f32 %v1558_v42, %v3176_v49  ;;  %v979_v51 = vadd.f32 %v3183_v56, %v978_v48 }
 0x29f   : > { %v3260_v54 = vpop.f32.mrf.mxu1 }
 0x2a0   : > { %v1626_v20 = vadd.f32 %v3150_v45, %v1559_v50  ;;  %v1072_v55 = vmax.f32 %v979_v51, 0.0 }
 0x2a2   : > { %v1658_v52 = vmax.f32 %v1626_v20, 0.0  ;;  %1270 = vmatmul.f32.gmra.mxu1 %v1072_v55 }
 0x2a4   : > { %1758 = vmatmul.f32.gmra.mxu2 %v1658_v52 }
 0x2a5   : > { %v1561_v17 = vpop.f32.mrf.mxu3  ;;  %v981_v29 = vpop.f32.mrf.mxu0 }
 0x2a6   : > { %v1562_v59 = vadd.f32 %v1561_v17, %v3188_v4  ;;  %v982_v60 = vadd.f32 %v3183_v56, %v981_v29 }
 0x2a7   : > { %v3265_v62 = vpop.f32.mrf.mxu2  ;;  %v3267_v1 = vpop.f32.mrf.mxu1 }
 0x2a8   : > { %v1627_v49 = vadd.f32 %v3150_v45, %v1562_v59  ;;  %v1073_v2 = vmax.f32 %v982_v60, 0.0 }
 0x2aa   : > { %v1659_v25 = vmax.f32 %v1627_v49, 0.0  ;;  %1273 = vmatmul.f32.gmra.mxu1 %v1073_v2 }
 0x2ac   : > { %1761 = vmatmul.f32.gmra.mxu2 %v1659_v25 }
 0x2ad   : > { %v1564_v5 = vpop.f32.mrf.mxu3  ;;  %v984_v31 = vpop.f32.mrf.mxu0 }
 0x2ae   : > { %v1565_v7 = vadd.f32 %v1564_v5, %v3195_v16  ;;  %v985_v9 = vadd.f32 %v3183_v56, %v984_v31 }
 0x2af   : > { %v3272_v40 = vpop.f32.mrf.mxu2  ;;  %v1229_v4 = vpop.f32.mrf.mxu1 }
 0x2b0   : > { %v1628_v12 = vadd.f32 %v3150_v45, %v1565_v7  ;;  %v1074_v13 = vmax.f32 %v985_v9, 0.0  ;;  %v1230_v63 = vadd.f32 %v3033_v61, %v1229_v4  ;;  %v3296_v61 = vld [vmem:[%s3495_s6] ss:$0 sm:$0xff] }
 0x2b2   : > { %v1660_v14 = vmax.f32 %v1628_v12, 0.0  ;;  %1276 = vmatmul.f32.gmra.mxu1 %v1074_v13 }
 0x2b4   : > { %1764 = vmatmul.f32.gmra.mxu2 %v1660_v14 }
 0x2b5   : > { %v1567_v15 = vpop.f32.mrf.mxu3  ;;  %v987_v19 = vpop.f32.mrf.mxu0 }
 0x2b6   : > { %v1568_v44 = vadd.f32 %v1567_v15, %v3205_v41  ;;  %v988_v23 = vadd.f32 %v3183_v56, %v987_v19 }
 0x2b7   : > { %v3277_v10 = vpop.f32.mrf.mxu2  ;;  %v1232_v16 = vpop.f32.mrf.mxu1 }
 0x2b8   : > { %v1629_v24 = vadd.f32 %v3150_v45, %v1568_v44  ;;  %v1075_v53 = vmax.f32 %v988_v23, 0.0  ;;  %v1233_v17 = vadd.f32 %v3296_v61, %v1232_v16 }
 0x2ba   : > { %v1661_v26 = vmax.f32 %v1629_v24, 0.0  ;;  %1279 = vmatmul.f32.gmra.mxu1 %v1075_v53 }
 0x2bc   : > { %1767 = vmatmul.f32.gmra.mxu2 %v1661_v26 }
 0x2bd   : > { %v1570_v28 = vpop.f32.mrf.mxu3  ;;  %v990_v30 = vpop.f32.mrf.mxu0 }
 0x2be   : > { %v1571_v41 = vadd.f32 %v1570_v28, %v3214_v0  ;;  %v991_v38 = vadd.f32 %v3183_v56, %v990_v30 }
 0x2bf   : > { %v1720_v39 = vpop.f32.mrf.mxu2  ;;  %v1235_v6 = vpop.f32.mrf.mxu1 }
 0x2c0   : > { %v1630_v42 = vadd.f32 %v3150_v45, %v1571_v41  ;;  %v1721_v48 = vadd.f32 %v3283_v35, %v1720_v39  ;;  %v1076_v50 = vmax.f32 %v991_v38, 0.0  ;;  %v1236_v4 = vadd.f32 %v3296_v61, %v1235_v6 }
 0x2c2   : > { %v1662_v51 = vmax.f32 %v1630_v42, 0.0  ;;  %v3290_v20 = vsub.f32 %v1230_v63, %v1721_v48  ;;  %1282 = vmatmul.f32.gmra.mxu1 %v1076_v50 }
 0x2c4   : > { %1770 = vmatmul.f32.gmra.mxu2 %v1662_v51 }
 0x2c5   : > { %v1573_v55 = vpop.f32.mrf.mxu3  ;;  %v993_v52 = vpop.f32.mrf.mxu0 }
 0x2c6   : > { %v1574_v0 = vadd.f32 %v1573_v55, %v3221_v33  ;;  %v994_v29 = vadd.f32 %v3183_v56, %v993_v52 }
 0x2c7   : > { %v1723_v59 = vpop.f32.mrf.mxu2  ;;  %v1238_v60 = vpop.f32.mrf.mxu1 }
 0x2c8   : > { %v1631_v49 = vadd.f32 %v3150_v45, %v1574_v0  ;;  %v1724_v2 = vadd.f32 %v3283_v35, %v1723_v59  ;;  %v1077_v25 = vmax.f32 %v994_v29, 0.0  ;;  %v1239_v26 = vadd.f32 %v3296_v61, %v1238_v60 }
 0x2ca   : > { %v1663_v5 = vmax.f32 %v1631_v49, 0.0  ;;  %v3302_v31 = vsub.f32 %v1233_v17, %v1724_v2  ;;  %1285 = vmatmul.f32.gmra.mxu1 %v1077_v25 }
 0x2cc   : > { %1773 = vmatmul.f32.gmra.mxu2 %v1663_v5 }
 0x2cd   : > { %v1576_v33 = vpop.f32.mrf.mxu3  ;;  %v996_v7 = vpop.f32.mrf.mxu0 }
 0x2ce   : > { %v1577_v9 = vadd.f32 %v1576_v33, %v3227_v37  ;;  %v997_v12 = vadd.f32 %v3183_v56, %v996_v7 }
 0x2cf   : > { %v1726_v13 = vpop.f32.mrf.mxu2  ;;  %v1241_v14 = vpop.f32.mrf.mxu1 }
 0x2d0   : > { %v1632_v15 = vadd.f32 %v3150_v45, %v1577_v9  ;;  %v1727_v19 = vadd.f32 %v3283_v35, %v1726_v13  ;;  %v1078_v44 = vmax.f32 %v997_v12, 0.0  ;;  %v1242_v51 = vadd.f32 %v3296_v61, %v1241_v14 }
 0x2d2   : > { %v1664_v23 = vmax.f32 %v1632_v15, 0.0  ;;  %v3309_v16 = vsub.f32 %v1236_v4, %v1727_v19  ;;  %1288 = vmatmul.f32.gmra.mxu1 %v1078_v44 }
 0x2d4   : > { %1776 = vmatmul.f32.gmra.mxu2 %v1664_v23 }
 0x2d5   : > { %v1579_v24 = vpop.f32.mrf.mxu3  ;;  %v999_v53 = vpop.f32.mrf.mxu0 }
 0x2d6   : > { %v1580_v37 = vadd.f32 %v1579_v24, %v3234_v57  ;;  %v1000_v28 = vadd.f32 %v3183_v56, %v999_v53 }
 0x2d7   : > { %v1729_v30 = vpop.f32.mrf.mxu2  ;;  %v1244_v41 = vpop.f32.mrf.mxu1 }
 0x2d8   : > { %v1633_v63 = vadd.f32 %v3150_v45, %v1580_v37  ;;  %v1730_v38 = vadd.f32 %v3283_v35, %v1729_v30  ;;  %v1079_v39 = vmax.f32 %v1000_v28, 0.0  ;;  %v1245_v5 = vadd.f32 %v3296_v61, %v1244_v41 }
 0x2da   : > { %v1665_v6 = vmax.f32 %v1633_v63, 0.0  ;;  %v3316_v42 = vsub.f32 %v1239_v26, %v1730_v38  ;;  %1291 = vmatmul.f32.gmra.mxu1 %v1079_v39 }
 0x2dc   : > { %1779 = vmatmul.f32.gmra.mxu2 %v1665_v6 }
 0x2dd   : > { %v1582_v48 = vpop.f32.mrf.mxu3  ;;  %v1002_v50 = vpop.f32.mrf.mxu0 }
 0x2de   : > { %v1583_v57 = vadd.f32 %v1582_v48, %v3243_v11  ;;  %v1003_v55 = vadd.f32 %v3183_v56, %v1002_v50 }
 0x2df   : > { %v1732_v52 = vpop.f32.mrf.mxu2  ;;  %v1247_v0 = vpop.f32.mrf.mxu1 }
 0x2e0   : > { %v1634_v17 = vadd.f32 %v3150_v45, %v1583_v57  ;;  %v1733_v29 = vadd.f32 %v3283_v35, %v1732_v52  ;;  %v1080_v59 = vmax.f32 %v1003_v55, 0.0  ;;  %v1248_v44 = vadd.f32 %v3296_v61, %v1247_v0 }
 0x2e2   : > { %v1666_v60 = vmax.f32 %v1634_v17, 0.0  ;;  %v3323_v49 = vsub.f32 %v1242_v51, %v1733_v29  ;;  %1294 = vmatmul.f32.gmra.mxu1 %v1080_v59 }
 0x2e4   : > { %1782 = vmatmul.f32.gmra.mxu2 %v1666_v60 }
 0x2e5   : > { %v1585_v2 = vpop.f32.mrf.mxu3  ;;  %v1005_v25 = vpop.f32.mrf.mxu0 }
 0x2e6   : > { %v1586_v11 = vadd.f32 %v1585_v2, %v3249_v27  ;;  %v1006_v33 = vadd.f32 %v3183_v56, %v1005_v25 }
 0x2e7   : > { %v1735_v7 = vpop.f32.mrf.mxu2  ;;  %v3328_v9 = vpop.f32.mrf.mxu1 }
 0x2e8   : > { %v1635_v4 = vadd.f32 %v3150_v45, %v1586_v11  ;;  %v1736_v12 = vadd.f32 %v3283_v35, %v1735_v7  ;;  %v1081_v13 = vmax.f32 %v1006_v33, 0.0 }
 0x2ea   : > { %v1667_v14 = vmax.f32 %v1635_v4, 0.0  ;;  %v3332_v15 = vsub.f32 %v1245_v5, %v1736_v12  ;;  %1297 = vmatmul.f32.gmra.mxu1 %v1081_v13 }
 0x2ec   : > { %1785 = vmatmul.f32.gmra.mxu2 %v1667_v14 }
 0x2ed   : > { %v1588_v19 = vpop.f32.mrf.mxu3 }
 0x2ee   : > { %v1589_v27 = vadd.f32 %v1588_v19, %v3256_v18 }
 0x2ef   : > { %v1738_v23 = vpop.f32.mrf.mxu2  ;;  %v1253_v56 = vpop.f32.mrf.mxu1 }
 0x2f0   : > { %v1636_v24 = vadd.f32 %v3150_v45, %v1589_v27  ;;  %v1739_v53 = vadd.f32 %v3283_v35, %v1738_v23 }
 0x2f2   : > { %v1668_v37 = vmax.f32 %v1636_v24, 0.0  ;;  %v3338_v26 = vsub.f32 %v1248_v44, %v1739_v53 }
 0x2f4   : > { %1788 = vmatmul.f32.gmra.mxu2 %v1668_v37 }
 0x2f5   : > { %v1591_v28 = vpop.f32.mrf.mxu3 }
 0x2f6   : > { %v1592_v30 = vadd.f32 %v1591_v28, %v3104_v32 }
 0x2f7   : > { %v3341_v41 = vpop.f32.mrf.mxu2  ;;  %v1256_v63 = vpop.f32.mrf.mxu1 }
 0x2f8   : > { %v1637_v18 = vadd.f32 %v3150_v45, %v1592_v30  ;;  %v1257_v28 = vadd.f32 %v3296_v61, %v1256_v63  ;;  %v1251_v63 = vadd.f32 %v3296_v61, %v3328_v9 }
 0x2fa   : > { %v1669_v38 = vmax.f32 %v1637_v18, 0.0 }
 0x2fc   : > { %1791 = vmatmul.f32.gmra.mxu2 %v1669_v38 }
 0x2fd   : > { %v1594_v39 = vpop.f32.mrf.mxu3 }
 0x2fe   : > { %v1595_v6 = vadd.f32 %v1594_v39, %v3113_v47 }
 0x2ff   : > { %v1744_v48 = vpop.f32.mrf.mxu2  ;;  %v1259_v50 = vpop.f32.mrf.mxu1 }
 0x300   : > { %v1638_v57 = vadd.f32 %v3150_v45, %v1595_v6  ;;  %v1260_v23 = vadd.f32 %v3296_v61, %v1259_v50  ;;  %v1254_v50 = vadd.f32 %v3296_v61, %v1253_v56 }
 0x302   : > { %v1670_v51 = vmax.f32 %v1638_v57, 0.0 }
 0x304   : > { %1794 = vmatmul.f32.gmra.mxu2 %v1670_v51  ;;  %v1745_v51 = vadd.f32 %v3283_v35, %v1744_v48 }
 0x305   : > { %v1597_v55 = vpop.f32.mrf.mxu3 }
 0x306   : > { %v1598_v52 = vadd.f32 %v1597_v55, %v3123_v3 }
 0x307   : > { %v1747_v32 = vpop.f32.mrf.mxu2  ;;  %v1262_v0 = vpop.f32.mrf.mxu1 }
 0x308   : > { %v1639_v17 = vadd.f32 %v3150_v45, %v1598_v52  ;;  %v1748_v18 = vadd.f32 %v3283_v35, %v1747_v32 }
 0x30a   : > { %v1671_v29 = vmax.f32 %v1639_v17, 0.0  ;;  %v1819_v55 = vsub.f32 %v1257_v28, %v1748_v18  ;;  %v1842_v28 = vmul.f32 %v3290_v20, %v3290_v20 }
 0x30c   : > { %1797 = vmatmul.f32.gmra.mxu2 %v1671_v29  ;;  %v1742_v29 = vadd.f32 %v3283_v35, %v3341_v41  ;;  %v1848_v41 = vmul.f32 %v3338_v26, %v3338_v26 }
 0x30d   : > { %v1600_v59 = vpop.f32.mrf.mxu3 }
 0x30e   : > { %v1601_v60 = vadd.f32 %v1600_v59, %v3133_v22  ;;  %v1263_v22 = vadd.f32 %v3296_v61, %v1262_v0  ;;  %v1818_v59 = vsub.f32 %v1254_v50, %v1745_v51  ;;  %v1817_v48 = vsub.f32 %v1251_v63, %v1742_v29 }
 0x30f   : > { %v1750_v2 = vpop.f32.mrf.mxu2  ;;  %v1265_v25 = vpop.f32.mrf.mxu1  ;;  %v1314_v29 = vadd.f32 %v3296_v61, %v3096_v21 }
 0x310   : > { %v1640_v47 = vadd.f32 %v3150_v45, %v1601_v60  ;;  %v1266_v13 = vadd.f32 %v3296_v61, %v1265_v25  ;;  %v1851_v60 = vmul.f32 %v1819_v55, %v1819_v55 }
 0x312   : > { %v1672_v11 = vmax.f32 %v1640_v47, 0.0  ;;  %v1850_v47 = vmul.f32 %v1818_v59, %v1818_v59 }
 0x314   : > { %1800 = vmatmul.f32.gmra.mxu2 %v1672_v11 }
 0x315   : > { %v1603_v5 = vpop.f32.mrf.mxu3 }
 0x316   : > { %v1604_v33 = vadd.f32 %v1603_v5, %v3140_v34  ;;  %v1751_v34 = vadd.f32 %v3283_v35, %v1750_v2  ;;  %v1849_v5 = vmul.f32 %v1817_v48, %v1817_v48 }
 0x317   : > { %v1753_v7 = vpop.f32.mrf.mxu2  ;;  %v1268_v12 = vpop.f32.mrf.mxu1 }
 0x318   : > { %v1641_v3 = vadd.f32 %v3150_v45, %v1604_v33  ;;  %v1754_v19 = vadd.f32 %v3283_v35, %v1753_v7  ;;  %v1269_v37 = vadd.f32 %v3296_v61, %v1268_v12  ;;  %v1820_v38 = vsub.f32 %v1260_v23, %v1751_v34 }
 0x319   : > { %v1847_v12 = vmul.f32 %v3332_v15, %v3332_v15  ;;  %v1845_v23 = vmul.f32 %v3316_v42, %v3316_v42  ;;  %v1844_v15 = vmul.f32 %v3309_v16, %v3309_v16  ;;  %v1224_v42 = vadd.f32 %v3296_v61, %v3260_v54 }
 0x31a   : > { %v1673_v4 = vmax.f32 %v1641_v3, 0.0  ;;  %v1821_v24 = vsub.f32 %v1263_v22, %v1754_v19  ;;  %v1852_v52 = vmul.f32 %v1820_v38, %v1820_v38  ;;  %v1846_v19 = vmul.f32 %v3323_v49, %v3323_v49 }
 0x31b   : > { %v1227_v49 = vadd.f32 %v3296_v61, %v3267_v1  ;;  %v1221_v1 = vadd.f32 %v3296_v61, %v3253_v43 }
 0x31c   : > { %1803 = vmatmul.f32.gmra.mxu2 %v1673_v4  ;;  %v1853_v39 = vmul.f32 %v1821_v24, %v1821_v24 }
 0x31f   : > { %v1756_v14 = vpop.f32.mrf.mxu2  ;;  %v1271_v45 = vpop.f32.mrf.mxu1 }
 0x320   : > { %v1757_v27 = vadd.f32 %v3283_v35, %v1756_v14  ;;  %v1272_v0 = vadd.f32 %v3296_v61, %v1271_v45  ;;  %v1843_v45 = vmul.f32 %v3302_v31, %v3302_v31 }
 0x322   : > { %v1822_v44 = vsub.f32 %v1266_v13, %v1757_v27 }
 0x324   : > { %v1854_v53 = vmul.f32 %v1822_v44, %v1822_v44 }
 0x326   : > { %1871 = vmatpush.xpose.msra.mxu3 %v1854_v53  ;;  %v1718_v53 = vadd.f32 %v3283_v35, %v3277_v10  ;;  %v1712_v10 = vadd.f32 %v3283_v35, %v3265_v62 }
 0x327   : > { %v1759_v30 = vpop.f32.mrf.mxu2  ;;  %v1274_v17 = vpop.f32.mrf.mxu1 }
 0x328   : > { %v1760_v6 = vadd.f32 %v3283_v35, %v1759_v30  ;;  %v1275_v25 = vadd.f32 %v3296_v61, %v1274_v17  ;;  %v1809_v16 = vsub.f32 %v1227_v49, %v1718_v53  ;;  %v1807_v54 = vsub.f32 %v1221_v1, %v1712_v10 }
 0x32a   : > { %v3362_v57 = vsub.f32 %v1269_v37, %v1760_v6  ;;  %1872 = vmatpush.xpose.msra.mxu3 %v1853_v39  ;;  %v1715_v37 = vadd.f32 %v3283_v35, %v3272_v40  ;;  %v1841_v18 = vmul.f32 %v1809_v16, %v1809_v16  ;;  %v1839_v39 = vmul.f32 %v1807_v54, %v1807_v54 }
 0x32c   : > { %v1808_v31 = vsub.f32 %v1224_v42, %v1715_v37 }
 0x32e   : > { %1873 = vmatpush.xpose.msra.mxu3 %v1852_v52  ;;  %v1840_v38 = vmul.f32 %v1808_v31, %v1808_v31 }
 0x32f   : > { %v1762_v32 = vpop.f32.mrf.mxu2  ;;  %v1277_v33 = vpop.f32.mrf.mxu1 }
 0x330   : > { %v1763_v2 = vadd.f32 %v3283_v35, %v1762_v32  ;;  %v1278_v3 = vadd.f32 %v3296_v61, %v1277_v33 }
 0x332   : > { %v3372_v56 = vsub.f32 %v1272_v0, %v1763_v2  ;;  %1874 = vmatpush.xpose.msra.mxu3 %v1851_v60  ;;  %v1311_v2 = vadd.f32 %v3296_v61, %v3085_v8 }
 0x336   : > { %1875 = vmatpush.xpose.msra.mxu3 %v1850_v47 }
 0x337   : > { %v1765_v11 = vpop.f32.mrf.mxu2  ;;  %v1280_v22 = vpop.f32.mrf.mxu1 }
 0x338   : > { %v1766_v9 = vadd.f32 %v3283_v35, %v1765_v11  ;;  %v1281_v27 = vadd.f32 %v3296_v61, %v1280_v22 }
 0x33a   : > { %v3376_v7 = vsub.f32 %v1275_v25, %v1766_v9  ;;  %1876 = vmatpush.xpose.msra.mxu3 %v1849_v5  ;;  %v1308_v9 = vadd.f32 %v3296_v61, %v3075_v58 }
 0x33e   : > { %1877 = vmatpush.xpose.msra.mxu3 %v1848_v41 }
 0x33f   : > { %v1768_v4 = vpop.f32.mrf.mxu2  ;;  %v1283_v51 = vpop.f32.mrf.mxu1 }
 0x340   : > { %v1769_v13 = vadd.f32 %v3283_v35, %v1768_v4  ;;  %v2658_v4 = vmov 1.0  }
 0x342   : > { %v3384_v14 = vsub.f32 %v1278_v3, %v1769_v13  ;;  %1878 = vmatpush.xpose.msra.mxu3 %v1847_v12  ;;  %v1305_v3 = vadd.f32 %v3296_v61, %v3066_v46 }
 0x346   : > { %1879 = vmatpush.xpose.msra.mxu3 %v1846_v19  ;;  %v1302_v19 = vadd.f32 %v3296_v61, %v3058_v36 }
 0x347   : > { %v1771_v26 = vpop.f32.mrf.mxu2  ;;  %v1286_v52 = vpop.f32.mrf.mxu1 }
 0x348   : > { %v1772_v44 = vadd.f32 %v3283_v35, %v1771_v26  ;;  %v1287_v10 = vadd.f32 %v3296_v61, %v1286_v52 }
 0x34a   : > { %v3392_v34 = vsub.f32 %v1281_v27, %v1772_v44  ;;  %1880 = vmatpush.xpose.msra.mxu3 %v1845_v23 }
 0x34c   : > { %v1859_v52 = vmul.f32 %v3392_v34, %v3392_v34 }
 0x34e   : > { %1881 = vmatpush.xpose.msra.mxu3 %v1844_v15 }
 0x34f   : > { %v3396_v24 = vpop.f32.mrf.mxu2  ;;  %v1289_v43 = vpop.f32.mrf.mxu1 }
 0x350   : > { %v1290_v37 = vadd.f32 %v3296_v61, %v1289_v43 }
 0x352   : > { %1882 = vmatpush.xpose.msra.mxu3 %v1843_v45 }
 0x356   : > { %1883 = vmatpush.xpose.msra.mxu3 %v1842_v28 }
 0x357   : > { %v3410_v30 = vpop.f32.mrf.mxu2  ;;  %v1292_v62 = vpop.f32.mrf.mxu1 }
 0x358   : > { %v1293_v53 = vadd.f32 %v3296_v61, %v1292_v62  ;;  %v1778_v31 = vadd.f32 %v3283_v35, %v3410_v30  ;;  %v1858_v30 = vmul.f32 %v3384_v14, %v3384_v14 }
 0x35a   : > { %1884 = vmatpush.xpose.msra.mxu3 %v1841_v18 }
 0x35e   : > { %1885 = vmatpush.xpose.msra.mxu3 %v1840_v38  ;;  %v1284_v38 = vadd.f32 %v3296_v61, %v1283_v51 }
 0x35f   : > { %v1780_v40 = vpop.f32.mrf.mxu2  ;;  %v1295_v47 = vpop.f32.mrf.mxu1 }
 0x360   : > { %v1296_v46 = vadd.f32 %v3296_v61, %v1295_v47  ;;  %v1781_v16 = vadd.f32 %v3283_v35, %v1780_v40 }
 0x362   : > { %1886 = vmatpush.xpose.msra.mxu3 %v1839_v39  ;;  %v1830_v18 = vsub.f32 %v1290_v37, %v1781_v16  ;;  %v1775_v39 = vadd.f32 %v3283_v35, %v3396_v24  ;;  %v1855_v24 = vmul.f32 %v3362_v57, %v3362_v57 }
 0x364   : > { %v1828_v40 = vsub.f32 %v1284_v38, %v1775_v39 }
 0x365   : > { %1887 = vmatmul.f32.vlgmr.msra.gmra.mxu3 %v2658_v4 }
 0x367   : > { %v1783_v6 = vpop.f32.mrf.mxu2  ;;  %v1298_v22 = vpop.f32.mrf.mxu1 }
 0x368   : > { %v1299_v58 = vadd.f32 %v3296_v61, %v1298_v22  ;;  %v1784_v45 = vadd.f32 %v3283_v35, %v1783_v6  ;;  %v1829_v6 = vsub.f32 %v1287_v10, %v1778_v31  ;;  %v1857_v61 = vmul.f32 %v3376_v7, %v3376_v7 }
 0x36a   : > { %v1831_v28 = vsub.f32 %v1293_v53, %v1784_v45 }
 0x36c   : > { %v1863_v54 = vmul.f32 %v1831_v28, %v1831_v28 }
 0x36f   : > { %v1786_v20 = vpop.f32.mrf.mxu2 }
 0x370   : > { %v1787_v23 = vadd.f32 %v3283_v35, %v1786_v20  ;;  %v1862_v20 = vmul.f32 %v1830_v18, %v1830_v18 }
 0x372   : > { %v1832_v36 = vsub.f32 %v1296_v46, %v1787_v23 }
 0x374   : > { %v1864_v1 = vmul.f32 %v1832_v36, %v1832_v36 }
 0x377   : > { %v1789_v50 = vpop.f32.mrf.mxu2 }
 0x378   : > { %v1790_v27 = vadd.f32 %v3283_v35, %v1789_v50  ;;  %v1861_v50 = vmul.f32 %v1829_v6, %v1829_v6 }
 0x37a   : > { %v1833_v15 = vsub.f32 %v1299_v58, %v1790_v27 }
 0x37c   : > { %v1865_v42 = vmul.f32 %v1833_v15, %v1833_v15 }
 0x37f   : > { %v1792_v55 = vpop.f32.mrf.mxu2 }
 0x380   : > { %v1793_v8 = vadd.f32 %v3283_v35, %v1792_v55  ;;  %v1860_v55 = vmul.f32 %v1828_v40, %v1828_v40 }
 0x382   : > { %v1834_v26 = vsub.f32 %v1302_v19, %v1793_v8 }
 0x384   : > { %v1866_v49 = vmul.f32 %v1834_v26, %v1834_v26 }
 0x387   : > { %v1795_v0 = vpop.f32.mrf.mxu2 }
 0x388   : > { %v1796_v33 = vadd.f32 %v3283_v35, %v1795_v0 }
 0x38a   : > { %v1835_v12 = vsub.f32 %v1305_v3, %v1796_v33 }
 0x38c   : > { %v1867_v44 = vmul.f32 %v1835_v12, %v1835_v12 }
 0x38f   : > { %v1798_v63 = vpop.f32.mrf.mxu2 }
 0x390   : > { %v1799_v25 = vadd.f32 %v3283_v35, %v1798_v63 }
 0x392   : > { %v1836_v21 = vsub.f32 %v1308_v9, %v1799_v25 }
 0x394   : > { %v1868_v13 = vmul.f32 %v1836_v21, %v1836_v21 }
 0x397   : > { %v1801_v32 = vpop.f32.mrf.mxu2 }
 0x398   : > { %v1802_v59 = vadd.f32 %v3283_v35, %v1801_v32 }
 0x39a   : > { %v1837_v11 = vsub.f32 %v1311_v2, %v1802_v59 }
 0x39c   : > { %v1869_v41 = vmul.f32 %v1837_v11, %v1837_v11 }
 0x39f   : > { %v1804_v17 = vpop.f32.mrf.mxu2 }
 0x3a0   : > { %v1805_v60 = vadd.f32 %v3283_v35, %v1804_v17  ;;  %v1856_v35 = vmul.f32 %v3372_v56, %v3372_v56 }
 0x3a2   : > { %v1838_v48 = vsub.f32 %v1314_v29, %v1805_v60 }
 0x3a4   : > { %v1870_v5 = vmul.f32 %v1838_v48, %v1838_v48 }
 0x3a6   : > { %1891 = vmatpush.xpose.msrb.mxu3 %v1870_v5  ;;  %v1943_v5 = vlaneseq }
 0x3a8   : > { %vm1945_vm5 = vcmp.lt.s32.totalorder %v1943_v5, 256 }
 0x3aa   : > { %1892 = vmatpush.xpose.msrb.mxu3 %v1869_v41 }
 0x3ae   : > { %1893 = vmatpush.xpose.msrb.mxu3 %v1868_v13 }
 0x3b2   : > { %1894 = vmatpush.xpose.msrb.mxu3 %v1867_v44 }
 0x3b6   : > { %1895 = vmatpush.xpose.msrb.mxu3 %v1866_v49 }
 0x3ba   : > { %1896 = vmatpush.xpose.msrb.mxu3 %v1865_v42 }
 0x3be   : > { %1897 = vmatpush.xpose.msrb.mxu3 %v1864_v1 }
 0x3c2   : > { %1898 = vmatpush.xpose.msrb.mxu3 %v1863_v54 }
 0x3c6   : > { %1899 = vmatpush.xpose.msrb.mxu3 %v1862_v20 }
 0x3ca   : > { %1900 = vmatpush.xpose.msrb.mxu3 %v1861_v50 }
 0x3ce   : > { %1901 = vmatpush.xpose.msrb.mxu3 %v1860_v55 }
 0x3d2   : > { %1902 = vmatpush.xpose.msrb.mxu3 %v1859_v52 }
 0x3d6   : > { %1903 = vmatpush.xpose.msrb.mxu3 %v1858_v30 }
 0x3da   : > { %1904 = vmatpush.xpose.msrb.mxu3 %v1857_v61 }
 0x3de   : > { %1905 = vmatpush.xpose.msrb.mxu3 %v1856_v35 }
 0x3e2   : > { %1906 = vmatpush.xpose.msrb.mxu3 %v1855_v24 }
 0x3e5   : > { %1907 = vmatmul.f32.vlgmr.msrb.gmra.mxu3 %v2658_v4 }
 0x3e8   : > { %v1888_v51 = vpop.f32.mrf.mxu3 }
 0x3e9   : > { %2321 = vrsqrt.f32 %v1888_v51  ;;  %vm1918_vm0 = vcmp.eq.f32.partialorder %v1888_v51, inf  ;;  %v1921_v2 = vand.u32 2147483648, %v1888_v51  ;;  %vm1920_vm1 = vcmp.eq.f32.partialorder %v1888_v51, 0.0 }
 0x3ef   : > { %v2322_v34 = vpop.eup %2321 }
 0x3f0   : > { %v1912_v0 = vmul.f32 %v2322_v34, %v1888_v51 }
 0x3f2   : > { %v1913_v14 = vmul.f32 %v2322_v34, %v1912_v0 }
 0x3f4   : > { %v1914_v7 = vmul.f32 0.5, %v1913_v14 }
 0x3f6   : > { %v1915_v63 = vsub.f32 1.5, %v1914_v7 }
 0x3f8   : > { %v1916_v56 = vmul.f32 %v2322_v34, %v1915_v63 }
 0x3fa   : > { %v1917_v59 = vmul.f32 %v1916_v56, %v1888_v51 }
 0x3fc   : > { %v1919_v48 = vsel %vm1918_vm0, %v1888_v51, %v1917_v59 }
 0x3fd   : > { %v1922_v33 = vsel %vm1920_vm1, %v1921_v2, %v1919_v48 }
 0x3fe   : > { %v1935_v41 = vmul.f32 0.5, %v1922_v33 }
 0x468   : > { %v1908_v43 = vpop.f32.mrf.mxu3 }
 0x469   : > { %2323 = vrsqrt.f32 %v1908_v43  ;;  %vm1930_vm2 = vcmp.eq.f32.partialorder %v1908_v43, inf  ;;  %v1933_v25 = vand.u32 2147483648, %v1908_v43  ;;  %vm1932_vm3 = vcmp.eq.f32.partialorder %v1908_v43, 0.0 }
 0x46f   : > { %v2324_v32 = vpop.eup %2323 }
 0x470   : > { %v1924_v62 = vmul.f32 %v2324_v32, %v1908_v43 }
 0x472   : > { %v1925_v17 = vmul.f32 %v2324_v32, %v1924_v62 }
 0x474   : > { %v1926_v29 = vmul.f32 0.5, %v1925_v17 }
 0x476   : > { %v1927_v57 = vsub.f32 1.5, %v1926_v29 }
 0x478   : > { %v1928_v60 = vmul.f32 %v2324_v32, %v1927_v57 }
 0x47a   : > { %v1929_v47 = vmul.f32 %v1928_v60, %v1908_v43 }
 0x47c   : > { %v1931_v11 = vsel %vm1930_vm2, %v1908_v43, %v1929_v47 }
 0x47d   : > { %v1934_v9 = vsel %vm1932_vm3, %v1933_v25, %v1931_v11 }
 0x47e   : > { %v1936_v21 = vmul.f32 0.5, %v1934_v9 }
 0x480   : > { %v1939_v3 = vrot.slane %v1936_v21, 7 }
 0x482   : > { %v1941_v4 = vsel %vm1940_vm4, %v1935_v41, %v1939_v3 }
 0x483   : > { %1947 = vst.msk [vmem:[%s597_s14] sm:$0x3] %vm1945_vm5, %v1941_v4 }
 0x484   : > { %2594 = shalt.err (!%p2591_p4)
}
 0x485   : > { %2233 = dma.vmem_to_hbm [thread:$0]  (%p2794_p12), %s1962_s28, 32, %s1964_s26, %s1949_s13  }
 0x486 PF: > { %s3550_s20 = sld [smem:[#allocation24_spill]] }
 0x487   : > { %s3552_s24 = sld [smem:[#allocation25_spill]] }
 0x48c   : > { %s1975_s30 = sand.u32 1, %s3550_s20  }
 0x48d   : > { %p3553_p2 = scmp.ge.s32.totalorder %s3552_s24, 2  ;;  %s1976_s19 = scalar_lea.sflag [#allocation5], %s1975_s30 }
 0x48f   : > { %p2262_p9 = pnand %p3553_p2, %p2812_p6 }
 0x491   : > { %p2263_p3 = pneg %p2262_p9 }
 0x493   : > { %2632 = dma.done.wait (%p2263_p3), %s1976_s19, 32  }
 0x494   : > { %2634 = vsyncadd (%p2263_p3), %s1976_s19, 4294967264  ;;  %s3554_s24 = sld [smem:[#allocation26_spill]]  ;;  %s3556_s21 = smov %s2641_s22 }
 0x495   : > { %s3555_s5 = sld [smem:[#allocation28_spill]]  ;;  %s3557_s22 = smov %s2645_s23 }
 0x49a   : > { %p31_p5 = scmp.ge.s32.totalorder %s3554_s24, 4  }
 0x49b   : > { %s3558_s23 = smov %s3555_s5 }
 0x49c   :  { %33 = sbr.rel (!%p31_p5) target bundleno = 17 (0x11), region = 157 }
 0x4a1   :  { %1982 = vsyncpa [#allocation4], 1 }
 0x4a2   :  { %1984 = vsyncpa [#allocation4 + $0x1], 1 }
 0x4a3   :  { %1985 = vsyncpa [#allocation7], 1 }
 0x4a4   :  { %1987 = vsyncpa [#allocation7 + $0x1], 1 }
 0x4a5   :  { %1988 = vsyncpa [#allocation10], 1 }
 0x4a6   :  { %1989 = vsyncpa [#allocation13], 1 }
 0x4a7   :  { %1990 = vsyncpa [#allocation16], 1 }
 0x4a8   :  { %1991 = vsyncpa [#allocation5], 1 }
 0x4a9   :  { %1993 = vsyncpa [#allocation5 + $0x1], 1 }

</bundles_post_ra>
